<compile_context>
chip_gen: v7x
topology: tpu7x:2x2x1
jax: 0.10.0
libtpu: 0.0.40
codegen_flags: <defaults>
</compile_context>

<pallas_src>
import functools

import jax
import jax.numpy as jnp
from jax import lax
from jax.experimental import pallas as pl
from jax.experimental.pallas import tpu as pltpu


# Output row layout (matches torch.cat order):
#   [0]      chern    -> tanh
#   [1:5]    z2       -> sigmoid
#   [5]      gap      -> softplus
#   [6:14]   symmetry -> identity
OUT_DIM = 1 + 4 + 1 + 8  # = 14


def _fused_heads_kernel(x_ref, w1_ref, b1_ref, w2t_ref, b2_ref, out_ref, *,
                        compute_dtype):
    # Layer 1 of every head (concatenated): (tb, H) @ (H, H1) + b1, SiLU.
    # x / w1 are read from HBM in their natural dtype and cast here (cheap VPU
    # work hidden under DMA/MXU) -> no wrapper-side convert round trip.
    x = x_ref[...].astype(compute_dtype)
    w1 = w1_ref[...].astype(compute_dtype)
    h = jnp.dot(x, w1, preferred_element_type=jnp.float32)
    h = h + b1_ref[...]
    h = h * jax.nn.sigmoid(h)            # SiLU in f32 (v5e has no bf16 VPU/EUP)

    # Layer 2 (block-diagonal), emitted directly in lane-dense transposed
    # layout: (14, H1) x (tb, H1) contracted on H1 -> (14, tb).  This avoids
    # both a big in-kernel transpose and 14-lane masked stores on the output.
    y_t = lax.dot_general(w2t_ref[...], h,
                          dimension_numbers=(((1,), (1,)), ((), ())),
                          preferred_element_type=jnp.float32)
    y_t = y_t + b2_ref[...]              # b2 is (14, 1): broadcasts over lanes

    # Per-head output activation, selected per output row.
    row = lax.broadcasted_iota(jnp.int32, y_t.shape, 0)
    out = jnp.where(
        row == 0, jnp.tanh(y_t),
        jnp.where(row <= 4, jax.nn.sigmoid(y_t),
                  jnp.where(row == 5, jax.nn.softplus(y_t), y_t)))
    out_ref[...] = out.astype(out_ref.dtype)


def _physical_vmem_bytes():
    try:
        return int(pltpu.get_tpu_info().vmem_capacity_bytes)
    except Exception:
        return 64 << 20  # conservative: v7x per-TensorCore VMEM


def _pick_block_b(B, H, phys_vmem):
    """Batch tile: MiB-scale f32 x tile per grid step (bigger where VMEM is
    larger), >= 4 grid steps (2 per v7x TensorCore) when the batch allows,
    multiple of 128 unless a single block covers the whole batch."""
    tile_bytes = (8 << 20) if phys_vmem >= (96 << 20) else (4 << 20)
    target = max(512, (tile_bytes // (H * 4)) // 128 * 128)
    if B >= 4 * 512:
        per4 = ((pl.cdiv(B, 4) + 127) // 128) * 128
        target = min(target, max(512, per4))
    return B if target >= B else target


@functools.partial(jax.jit, static_argnames=("block_b", "compute_dtype"))
def topological_feature_extractor(x, w1, b1, w2, b2, *, block_b=None,
                                  compute_dtype=jnp.float32):
    """x: (B, H).  w1: (H, H1), b1: (H1,) or (1, H1), w2: (H1, 14) block-diag,
    b2: (14,) or (1, 14).  Returns (B, 14) matching the torch.cat order."""
    B, H = x.shape
    H1 = w1.shape[1]

    phys_vmem = _physical_vmem_bytes()
    if block_b is None:
        block_b = _pick_block_b(B, H, phys_vmem)
    else:
        block_b = min(int(block_b), B)
        if block_b < B:
            block_b = max(128, ((block_b + 127) // 128) * 128)
            if block_b >= B:
                block_b = B

    # Lane-dense output layout: the kernel writes (14, B); repack w2 / b2 so
    # layer 2 produces that layout directly (tiny wrapper-side transposes).
    w1_f = w1.astype(jnp.float32)
    b1_f = jnp.reshape(b1.astype(jnp.float32), (1, H1))
    w2t_f = jnp.transpose(w2.astype(jnp.float32))            # (14, H1)
    b2_f = jnp.reshape(b2.astype(jnp.float32), (OUT_DIM, 1))  # (14, 1)

    # Scoped-VMEM budget: double-buffered x/out tiles, (double-buffered)
    # resident weights, the layer-1 activation and elementwise temps, plus
    # headroom; capped at physical VMEM minus 8 MiB (Mosaic scratch/semaphores).
    itemsize_c = jnp.dtype(compute_dtype).itemsize
    x_tile = block_b * H * 4
    w_all = (H * H1 + H1 + H1 * OUT_DIM + OUT_DIM) * 4
    h_tile = block_b * H1 * 4
    out_tile = OUT_DIM * block_b * 4
    vmem_needed = (2 * x_tile + block_b * H * itemsize_c      # x tiles + cast copy
                   + 2 * w_all + H * H1 * itemsize_c          # weights + cast w1
                   + 3 * h_tile                               # h + SiLU temps
                   + 4 * out_tile                             # out tiles + temps
                   + (4 << 20))
    vmem_cap = phys_vmem - (8 << 20)
    vmem_limit = int(min(vmem_cap, max(vmem_needed, 32 << 20)))

    flops = 2 * B * H * H1 + 2 * B * H1 * OUT_DIM
    transcendentals = B * H1 + 6 * B
    bytes_accessed = 4 * (B * H + H * H1 + H1 + H1 * OUT_DIM
                          + OUT_DIM + OUT_DIM * B)

    grid = (pl.cdiv(B, block_b),)
    kernel = functools.partial(_fused_heads_kernel, compute_dtype=compute_dtype)

    out_t = pl.pallas_call(
        kernel,
        out_shape=jax.ShapeDtypeStruct((OUT_DIM, B), jnp.float32),
        grid_spec=pltpu.PrefetchScalarGridSpec(
            num_scalar_prefetch=0,
            grid=grid,
            # TODO(synk): add pipeline_mode=pl.Buffered(1) to the grid-invariant
            # weight specs to halve their VMEM residency at large H.
            in_specs=[
                pl.BlockSpec((block_b, H), lambda i: (i, 0)),     # x
                pl.BlockSpec((H, H1), lambda i: (0, 0)),          # w1
                pl.BlockSpec((1, H1), lambda i: (0, 0)),          # b1
                pl.BlockSpec((OUT_DIM, H1), lambda i: (0, 0)),    # w2^T
                pl.BlockSpec((OUT_DIM, 1), lambda i: (0, 0)),     # b2 (col)
            ],
            out_specs=pl.BlockSpec((OUT_DIM, block_b), lambda i: (0, i)),
        ),
        compiler_params=pltpu.CompilerParams(
            dimension_semantics=("parallel",),
            vmem_limit_bytes=vmem_limit),
        cost_estimate=pl.CostEstimate(flops=flops,
                                      transcendentals=transcendentals,
                                      bytes_accessed=bytes_accessed),
    )(x, w1_f, b1_f, w2t_f, b2_f)

    # Back to the module's (batch, 14) layout (cheap layout plumbing).
    return jnp.transpose(out_t)


def make_params(hidden_dim, key):
    """Deterministically build packed parameters for the 4 heads.

    Head i: Linear(hidden, h_i) -> SiLU -> Linear(h_i, o_i) -> act_i
      chern: h=H//2,o=1   z2: h=H//2,o=4   gap: h=H//4,o=1   symmetry: h=H//2,o=8
    Packed as: W1 (H, sum h_i), b1 (1, sum h_i),
               W2 block-diag (sum h_i, 14), b2 (1, 14).
    """
    H = hidden_dim
    head_hidden = [H // 2, H // 2, H // 4, H // 2]
    head_out = [1, 4, 1, 8]
    H1 = sum(head_hidden)

    keys = jax.random.split(key, 16)
    k_iter = iter(keys)

    w1_blocks, b1_blocks = [], []
    w2 = jnp.zeros((H1, OUT_DIM), jnp.float32)
    b2_blocks = []
    row_off, col_off = 0, 0
    for h, o in zip(head_hidden, head_out):
        lim1 = 1.0 / jnp.sqrt(H)
        w1_blocks.append(jax.random.uniform(next(k_iter), (H, h),
                                            jnp.float32, -lim1, lim1))
        b1_blocks.append(jax.random.uniform(next(k_iter), (h,),
                                            jnp.float32, -lim1, lim1))
        lim2 = 1.0 / jnp.sqrt(h)
        w2_blk = jax.random.uniform(next(k_iter), (h, o),
                                    jnp.float32, -lim2, lim2)
        w2 = w2.at[row_off:row_off + h, col_off:col_off + o].set(w2_blk)
        b2_blocks.append(jax.random.uniform(next(k_iter), (o,),
                                            jnp.float32, -lim2, lim2))
        row_off += h
        col_off += o

    w1 = jnp.concatenate(w1_blocks, axis=1)              # (H, H1)
    b1 = jnp.concatenate(b1_blocks, axis=0)[None, :]     # (1, H1)
    b2 = jnp.concatenate(b2_blocks, axis=0)[None, :]     # (1, 14)
    return w1, b1, w2, b2


def reference_forward(x, w1, b1, w2, b2):
    """Pure-JAX reference mirroring the PyTorch module semantics."""
    h = x @ w1 + b1
    h = h * jax.nn.sigmoid(h)          # SiLU
    y = h @ w2 + b2                    # block-diagonal == per-head matmuls
    chern = jnp.tanh(y[:, 0:1])
    z2 = jax.nn.sigmoid(y[:, 1:5])
    gap = jax.nn.softplus(y[:, 5:6])
    sym = y[:, 6:14]
    return jnp.concatenate([chern, z2, gap, sym], axis=-1)


if __name__ == "__main__":
    hidden_dim = 32
    batch = 512

    key = jax.random.PRNGKey(0)
    k_x, k_p = jax.random.split(key)
    x = jax.random.normal(k_x, (batch, hidden_dim), jnp.float32)
    w1, b1, w2, b2 = make_params(hidden_dim, k_p)
    ref = reference_forward(x, w1, b1, w2, b2)

    # 1) Default path: f32 compute, faithful to the PyTorch module.
    out_f32 = jax.block_until_ready(
        topological_feature_extractor(x, w1, b1, w2, b2))
    assert out_f32.shape == (batch, OUT_DIM), out_f32.shape
    assert jnp.allclose(out_f32, ref, atol=1e-4, rtol=1e-4), \
        float(jnp.max(jnp.abs(out_f32 - ref)))

    # 2) Performance path: bf16 layer-1 matmul (cast in-kernel), f32 epilogue.
    out_bf16 = jax.block_until_ready(
        topological_feature_extractor(x, w1, b1, w2, b2,
                                      compute_dtype=jnp.bfloat16))
    ref_q = reference_forward(x.astype(jnp.bfloat16).astype(jnp.float32),
                              w1.astype(jnp.bfloat16).astype(jnp.float32),
                              b1, w2, b2)
    assert out_bf16.shape == (batch, OUT_DIM), out_bf16.shape
    assert jnp.allclose(out_bf16, ref_q, atol=1e-3, rtol=1e-3), \
        float(jnp.max(jnp.abs(out_bf16 - ref_q)))
    assert jnp.allclose(out_bf16, ref, atol=5e-2, rtol=5e-2), \
        float(jnp.max(jnp.abs(out_bf16 - ref)))

    # 3) Ragged batch: B not a multiple of block_b (partial last block).
    B2 = 193
    x2 = jax.random.normal(jax.random.PRNGKey(1), (B2, hidden_dim), jnp.float32)
    out_r = jax.block_until_ready(
        topological_feature_extractor(x2, w1, b1, w2, b2, block_b=128))
    ref_r = reference_forward(x2, w1, b1, w2, b2)
    assert out_r.shape == (B2, OUT_DIM), out_r.shape
    assert jnp.allclose(out_r, ref_r, atol=1e-4, rtol=1e-4), \
        float(jnp.max(jnp.abs(out_r - ref_r)))

    print("KERNEL_OK")
</pallas_src>

<mosaic_0001>
module attributes {stable_mosaic.version = 11 : i64} {
  func.func @_fused_heads_kernel(%arg0: i32, %arg1: memref<512x32xf32, #tpu.memory_space<vmem>>, %arg2: memref<32x56xf32, #tpu.memory_space<vmem>>, %arg3: memref<1x56xf32, #tpu.memory_space<vmem>>, %arg4: memref<14x56xf32, #tpu.memory_space<vmem>>, %arg5: memref<14x1xf32, #tpu.memory_space<vmem>>, %arg6: memref<14x512xf32, #tpu.memory_space<vmem>>) attributes {dimension_semantics = [#tpu.dimension_semantics<parallel>], iteration_bounds = array<i64: 1>, scalar_prefetch = 0 : i64, scratch_operands = 0 : i64, tpu.core_type = #tpu.core_type<tc>, window_params = [{transform_indices = @transform_0, window_bounds = array<i64: 512, 32>}, {pipeline_mode = #tpu.pipeline_mode<synchronous>, transform_indices = @transform_1, window_bounds = array<i64: 32, 56>}, {pipeline_mode = #tpu.pipeline_mode<synchronous>, transform_indices = @transform_2, window_bounds = array<i64: 1, 56>}, {pipeline_mode = #tpu.pipeline_mode<synchronous>, transform_indices = @transform_3, window_bounds = array<i64: 14, 56>}, {pipeline_mode = #tpu.pipeline_mode<synchronous>, transform_indices = @transform_4, window_bounds = array<i64: 14, 1>}, {transform_indices = @transform_5, window_bounds = array<i64: 14, 512>}]} {
    %c0 = arith.constant 0 : index
    %c0_0 = arith.constant 0 : index
    %0 = vector.load %arg1[%c0, %c0_0] : memref<512x32xf32, #tpu.memory_space<vmem>>, vector<512x32xf32>
    %c0_1 = arith.constant 0 : index
    %c0_2 = arith.constant 0 : index
    %1 = vector.load %arg2[%c0_1, %c0_2] : memref<32x56xf32, #tpu.memory_space<vmem>>, vector<32x56xf32>
    %cst = arith.constant dense<0.000000e+00> : vector<512x56xf32>
    %2 = tpu.matmul %0, %1, %cst {dimension_numbers = #tpu.dot_dimension_numbers<[1], [0], [0], [1], [0, 0, 1, 1], [], []>} : vector<512x32xf32>, vector<32x56xf32>, vector<512x56xf32> -> vector<512x56xf32>
    %c0_3 = arith.constant 0 : index
    %c0_4 = arith.constant 0 : index
    %3 = vector.load %arg3[%c0_3, %c0_4] : memref<1x56xf32, #tpu.memory_space<vmem>>, vector<1x56xf32>
    %4 = vector.broadcast %3 : vector<1x56xf32> to vector<512x56xf32>
    %5 = arith.addf %2, %4 : vector<512x56xf32>
    %6 = arith.negf %5 : vector<512x56xf32>
    %7 = math.exp %6 : vector<512x56xf32>
    %cst_5 = arith.constant 1.000000e+00 : f32
    %8 = vector.broadcast %cst_5 : f32 to vector<512x56xf32>
    %9 = arith.addf %8, %7 : vector<512x56xf32>
    %10 = arith.divf %8, %9 : vector<512x56xf32>
    %11 = arith.mulf %5, %10 : vector<512x56xf32>
    %c0_6 = arith.constant 0 : index
    %c0_7 = arith.constant 0 : index
    %12 = vector.load %arg4[%c0_6, %c0_7] : memref<14x56xf32, #tpu.memory_space<vmem>>, vector<14x56xf32>
    %cst_8 = arith.constant dense<0.000000e+00> : vector<14x512xf32>
    %13 = tpu.matmul %12, %11, %cst_8 {dimension_numbers = #tpu.dot_dimension_numbers<[1], [1], [0], [0], [0, 0, 1, 0], [], []>} : vector<14x56xf32>, vector<512x56xf32>, vector<14x512xf32> -> vector<14x512xf32>
    %c0_9 = arith.constant 0 : index
    %c0_10 = arith.constant 0 : index
    %14 = vector.load %arg5[%c0_9, %c0_10] : memref<14x1xf32, #tpu.memory_space<vmem>>, vector<14x1xf32>
    %15 = vector.broadcast %14 : vector<14x1xf32> to vector<14x512xf32>
    %16 = arith.addf %13, %15 : vector<14x512xf32>
    %17 = tpu.iota {dimensions = array<i32: 0>} : vector<14x512xi32>
    %c0_i32 = arith.constant 0 : i32
    %18 = vector.broadcast %c0_i32 : i32 to vector<14x512xi32>
    %19 = arith.cmpi eq, %17, %18 : vector<14x512xi32>
    %20 = math.tanh %16 : vector<14x512xf32>
    %c4_i32 = arith.constant 4 : i32
    %21 = vector.broadcast %c4_i32 : i32 to vector<14x512xi32>
    %22 = arith.cmpi sle, %17, %21 : vector<14x512xi32>
    %23 = arith.negf %16 : vector<14x512xf32>
    %24 = math.exp %23 : vector<14x512xf32>
    %cst_11 = arith.constant 1.000000e+00 : f32
    %25 = vector.broadcast %cst_11 : f32 to vector<14x512xf32>
    %26 = arith.addf %25, %24 : vector<14x512xf32>
    %27 = arith.divf %25, %26 : vector<14x512xf32>
    %c5_i32 = arith.constant 5 : i32
    %28 = vector.broadcast %c5_i32 : i32 to vector<14x512xi32>
    %29 = arith.cmpi eq, %17, %28 : vector<14x512xi32>
    %cst_12 = arith.constant 0.000000e+00 : f32
    %30 = vector.broadcast %cst_12 : f32 to vector<14x512xf32>
    %31 = arith.maximumf %16, %30 : vector<14x512xf32>
    %32 = vector.broadcast %cst_12 : f32 to vector<14x512xf32>
    %33 = arith.subf %16, %32 : vector<14x512xf32>
    %34 = arith.cmpf one, %33, %33 : vector<14x512xf32>
    %35 = vector.broadcast %cst_12 : f32 to vector<14x512xf32>
    %36 = arith.addf %16, %35 : vector<14x512xf32>
    %37 = math.absf %33 : vector<14x512xf32>
    %cst_13 = arith.constant 0.000000e+00 : f32
    %38 = vector.broadcast %cst_13 : f32 to vector<14x512xf32>
    %39 = arith.subf %38, %37 : vector<14x512xf32>
    %40 = math.exp %39 : vector<14x512xf32>
    %41 = math.log1p %40 : vector<14x512xf32>
    %42 = arith.addf %31, %41 : vector<14x512xf32>
    %43 = arith.select %34, %36, %42 : vector<14x512xi1>, vector<14x512xf32>
    %44 = arith.select %29, %43, %16 : vector<14x512xi1>, vector<14x512xf32>
    %45 = arith.select %22, %27, %44 : vector<14x512xi1>, vector<14x512xf32>
    %46 = arith.select %19, %20, %45 : vector<14x512xi1>, vector<14x512xf32>
    %c0_14 = arith.constant 0 : index
    %c0_15 = arith.constant 0 : index
    %47 = vector.load %arg6[%c0_14, %c0_15] : memref<14x512xf32, #tpu.memory_space<vmem>>, vector<14x512xf32>
    tpu.vector_store %arg6[%c0_14, %c0_15], %46 {strides = array<i32>} : memref<14x512xf32, #tpu.memory_space<vmem>>, vector<14x512xf32>,
    return
  }
  func.func @transform_0(%arg0: i32) -> (i32, i32) {
    %c0_i32 = arith.constant 0 : i32
    %c0_i32_0 = arith.constant 0 : i32
    return %arg0, %c0_i32 : i32, i32
  }
  func.func @transform_1(%arg0: i32) -> (i32, i32) {
    %c0_i32 = arith.constant 0 : i32
    %c0_i32_0 = arith.constant 0 : i32
    %c0_i32_1 = arith.constant 0 : i32
    return %c0_i32, %c0_i32_0 : i32, i32
  }
  func.func @transform_2(%arg0: i32) -> (i32, i32) {
    %c0_i32 = arith.constant 0 : i32
    %c0_i32_0 = arith.constant 0 : i32
    %c0_i32_1 = arith.constant 0 : i32
    return %c0_i32, %c0_i32_0 : i32, i32
  }
  func.func @transform_3(%arg0: i32) -> (i32, i32) {
    %c0_i32 = arith.constant 0 : i32
    %c0_i32_0 = arith.constant 0 : i32
    %c0_i32_1 = arith.constant 0 : i32
    return %c0_i32, %c0_i32_0 : i32, i32
  }
  func.func @transform_4(%arg0: i32) -> (i32, i32) {
    %c0_i32 = arith.constant 0 : i32
    %c0_i32_0 = arith.constant 0 : i32
    %c0_i32_1 = arith.constant 0 : i32
    return %c0_i32, %c0_i32_0 : i32, i32
  }
  func.func @transform_5(%arg0: i32) -> (i32, i32) {
    %c0_i32 = arith.constant 0 : i32
    %c0_i32_0 = arith.constant 0 : i32
    return %c0_i32, %arg0 : i32, i32
  }
}

</mosaic_0001>

<bundles_post_ra>
// kernel: topological_feature_extractor.1
= control target key start
LH: loop header
LB: loop body
LE: loop exit
PB: predicated region body
PF: predicated region fallthrough
CT: control target
= control target key end

     0   :  { %vm96_vm0 = vcmask 261120   ;;  %s3630_s0 = inlined_call_operand.vmem [shape: f32[512,32], index: 0, kind: input, shape index: {}]   ;;  %s3631_s1 = inlined_call_operand.vmem [shape: f32[32,56], index: 1, kind: input, shape index: {}]   ;;  %s3632_s2 = inlined_call_operand.vmem [shape: f32[1,56], index: 2, kind: input, shape index: {}]   ;;  %s3633_s3 = inlined_call_operand.vmem [shape: f32[14,56], index: 3, kind: input, shape index: {}]   ;;  %s3634_s4 = inlined_call_operand.vmem [shape: f32[14,1], index: 4, kind: input, shape index: {}]   ;;  %s3635_s5 = inlined_call_operand.hbm [shape: f32[14,512], index: 5, kind: output, shape index: {}]  }
   0x1   :  { %v85_v0 = vld [vmem:[%s3631_s1] sm:$0xff]  ;;  %v86_v1 = vld [vmem:[%s3631_s1 + $0x8] sm:$0xff]  ;;  %v87_v2 = vld [vmem:[%s3631_s1 + $0x10] sm:$0xff] }
   0x2   :  { %v2195_v3 = vpack.c.bf16 %v86_v1, %v85_v0  ;;  %v88_v4 = vld [vmem:[%s3631_s1 + $0x18] sm:$0xff]  ;;  %v21_v5 = vld [vmem:[%s3630_s0] sm:$0xff]  ;;  %v22_v7 = vld [vmem:[%s3630_s0 + $0x8] sm:$0xff] }
   0x3   :  { %v2199_v6 = vpack.c.bf16 %v88_v4, %v87_v2  ;;  %2099 = vmatprep.mubr.msk.f32.mxu0 %vm96_vm0, %v21_v5  ;;  %v23_v8 = vld [vmem:[%s3630_s0 + $0x10] sm:$0xff]  ;;  %v24_v9 = vld [vmem:[%s3630_s0 + $0x18] sm:$0xff]  ;;  %v25_v10 = vld [vmem:[%s3630_s0 + $0x20] sm:$0xff] }
   0x4   :  { %2196 = vmatprep.subr.bf16.mxu0 %v2195_v3  ;;  %v26_v11 = vld [vmem:[%s3630_s0 + $0x28] sm:$0xff]  ;;  %v27_v12 = vld [vmem:[%s3630_s0 + $0x30] sm:$0xff]  ;;  %v28_v13 = vld [vmem:[%s3630_s0 + $0x38] sm:$0xff] }
   0x5   :  { %2198 = vmatpush3.bf16.msra.mxu0 %v2195_v3  ;;  %v29_v14 = vld [vmem:[%s3630_s0 + $0x40] sm:$0xff] }
   0x6   :  { %2200 = vmatprep.subr.bf16.mxu0 %v2199_v6 }
   0x9   :  { %2202 = vmatpush3.bf16.msra.mxu0 %v2199_v6 }
   0xc   :  { %2100 = vmatmul.mubr.msk.f32.vlgmr.msra.gmra.mrb[0].mxu0 %vm96_vm0, %v22_v7 }
   0xd   :  { %2102 = vmatprep.mubr.msk.f32.mxu0 %vm96_vm0, %v23_v8 }
  0x10   :  { %2103 = vmatmul.mubr.msk.f32.gmra.mrb[2].mxu0 %vm96_vm0, %v24_v9 }
  0x11   :  { %2105 = vmatprep.mubr.msk.f32.mxu0 %vm96_vm0, %v25_v10 }
  0x14   :  { %2106 = vmatmul.mubr.msk.f32.gmra.mrb[4].mxu0 %vm96_vm0, %v26_v11 }
  0x15   :  { %2108 = vmatprep.mubr.msk.f32.mxu0 %vm96_vm0, %v27_v12 }
  0x16   :  { %10 = vsyncpa [#allocation3], 0  ;;  %v30_v15 = vld [vmem:[%s3630_s0 + $0x48] sm:$0xff]  ;;  %v31_v16 = vld [vmem:[%s3630_s0 + $0x50] sm:$0xff]  ;;  %vm1136_vm1 = vcmask 457728  }
  0x17   :  { %v32_v17 = vld [vmem:[%s3630_s0 + $0x58] sm:$0xff]  ;;  %v33_v18 = vld [vmem:[%s3630_s0 + $0x60] sm:$0xff]  ;;  %v34_v19 = vld [vmem:[%s3630_s0 + $0x68] sm:$0xff] }
  0x18   :  { %2109 = vmatmul.mubr.msk.f32.gmra.mrb[6].mxu0 %vm96_vm0, %v28_v13  ;;  %v35_v20 = vld [vmem:[%s3630_s0 + $0x70] sm:$0xff]  ;;  %v36_v21 = vld [vmem:[%s3630_s0 + $0x78] sm:$0xff]  ;;  %v37_v22 = vld [vmem:[%s3630_s0 + $0x80] sm:$0xff] }
  0x19   :  { %2111 = vmatprep.mubr.msk.f32.mxu0 %vm96_vm0, %v29_v14  ;;  %v38_v23 = vld [vmem:[%s3630_s0 + $0x88] sm:$0xff]  ;;  %v39_v24 = vld [vmem:[%s3630_s0 + $0x90] sm:$0xff]  ;;  %v40_v25 = vld [vmem:[%s3630_s0 + $0x98] sm:$0xff] }
  0x1a   :  { %v41_v26 = vld [vmem:[%s3630_s0 + $0xa0] sm:$0xff]  ;;  %v42_v27 = vld [vmem:[%s3630_s0 + $0xa8] sm:$0xff]  ;;  %v43_v28 = vld [vmem:[%s3630_s0 + $0xb0] sm:$0xff] }
  0x1b   :  { %v44_v29 = vld [vmem:[%s3630_s0 + $0xb8] sm:$0xff]  ;;  %v45_v30 = vld [vmem:[%s3630_s0 + $0xc0] sm:$0xff]  ;;  %v46_v31 = vld [vmem:[%s3630_s0 + $0xc8] sm:$0xff] }
  0x1c   :  { %2112 = vmatmul.mubr.msk.f32.gmra.mrb[8].mxu0 %vm96_vm0, %v30_v15  ;;  %v47_v32 = vld [vmem:[%s3630_s0 + $0xd0] sm:$0xff]  ;;  %v48_v33 = vld [vmem:[%s3630_s0 + $0xd8] sm:$0xff]  ;;  %v49_v34 = vld [vmem:[%s3630_s0 + $0xe0] sm:$0xff] }
  0x1d   :  { %2114 = vmatprep.mubr.msk.f32.mxu0 %vm96_vm0, %v31_v16  ;;  %v50_v35 = vld [vmem:[%s3630_s0 + $0xe8] sm:$0xff]  ;;  %v51_v36 = vld [vmem:[%s3630_s0 + $0xf0] sm:$0xff]  ;;  %v52_v37 = vld [vmem:[%s3630_s0 + $0xf8] sm:$0xff] }
  0x1e   :  { %v53_v38 = vld [vmem:[%s3630_s0 + $0x100] sm:$0xff]  ;;  %v54_v39 = vld [vmem:[%s3630_s0 + $0x108] sm:$0xff]  ;;  %v55_v40 = vld [vmem:[%s3630_s0 + $0x110] sm:$0xff] }
  0x1f   :  { %v56_v41 = vld [vmem:[%s3630_s0 + $0x118] sm:$0xff]  ;;  %v57_v42 = vld [vmem:[%s3630_s0 + $0x120] sm:$0xff]  ;;  %v58_v43 = vld [vmem:[%s3630_s0 + $0x128] sm:$0xff] }
  0x20   :  { %2115 = vmatmul.mubr.msk.f32.gmra.mrb[10].mxu0 %vm96_vm0, %v32_v17  ;;  %v59_v44 = vld [vmem:[%s3630_s0 + $0x130] sm:$0xff]  ;;  %v60_v45 = vld [vmem:[%s3630_s0 + $0x138] sm:$0xff]  ;;  %v61_v46 = vld [vmem:[%s3630_s0 + $0x140] sm:$0xff] }
  0x21   :  { %2117 = vmatprep.mubr.msk.f32.mxu0 %vm96_vm0, %v33_v18  ;;  %v62_v47 = vld [vmem:[%s3630_s0 + $0x148] sm:$0xff]  ;;  %v63_v48 = vld [vmem:[%s3630_s0 + $0x150] sm:$0xff]  ;;  %v64_v49 = vld [vmem:[%s3630_s0 + $0x158] sm:$0xff] }
  0x22   :  { %v65_v50 = vld [vmem:[%s3630_s0 + $0x160] sm:$0xff]  ;;  %v66_v51 = vld [vmem:[%s3630_s0 + $0x168] sm:$0xff]  ;;  %v67_v52 = vld [vmem:[%s3630_s0 + $0x170] sm:$0xff] }
  0x23   :  { %v68_v53 = vld [vmem:[%s3630_s0 + $0x178] sm:$0xff]  ;;  %v69_v54 = vld [vmem:[%s3630_s0 + $0x180] sm:$0xff]  ;;  %v70_v55 = vld [vmem:[%s3630_s0 + $0x188] sm:$0xff] }
  0x24   :  { %2118 = vmatmul.mubr.msk.f32.gmra.mrb[12].mxu0 %vm96_vm0, %v34_v19  ;;  %v71_v56 = vld [vmem:[%s3630_s0 + $0x190] sm:$0xff]  ;;  %v72_v57 = vld [vmem:[%s3630_s0 + $0x198] sm:$0xff]  ;;  %v73_v58 = vld [vmem:[%s3630_s0 + $0x1a0] sm:$0xff] }
  0x25   :  { %2120 = vmatprep.mubr.msk.f32.mxu0 %vm96_vm0, %v35_v20  ;;  %v74_v59 = vld [vmem:[%s3630_s0 + $0x1a8] sm:$0xff]  ;;  %v75_v60 = vld [vmem:[%s3630_s0 + $0x1b0] sm:$0xff]  ;;  %v76_v61 = vld [vmem:[%s3630_s0 + $0x1b8] sm:$0xff] }
  0x26   :  { %v77_v62 = vld [vmem:[%s3630_s0 + $0x1c0] sm:$0xff]  ;;  %v78_v63 = vld [vmem:[%s3630_s0 + $0x1c8] sm:$0xff]  ;;  %v79_v0 = vld [vmem:[%s3630_s0 + $0x1d0] sm:$0xff] }
  0x27   :  { %v80_v1 = vld [vmem:[%s3630_s0 + $0x1d8] sm:$0xff]  ;;  %v81_v2 = vld [vmem:[%s3630_s0 + $0x1e0] sm:$0xff]  ;;  %v82_v3 = vld [vmem:[%s3630_s0 + $0x1e8] sm:$0xff] }
  0x28   :  { %2121 = vmatmul.mubr.msk.f32.gmra.mrb[14].mxu0 %vm96_vm0, %v36_v21  ;;  %v83_v4 = vld [vmem:[%s3630_s0 + $0x1f0] sm:$0xff]  ;;  %v84_v5 = vld [vmem:[%s3630_s0 + $0x1f8] sm:$0xff]  ;;  %v2931_v6 = vld [vmem:[%s3632_s2] ss:$0 sm:$0xff] }
  0x29   :  { %2123 = vmatprep.mubr.msk.f32.mxu0 %vm96_vm0, %v37_v22  ;;  %v1122_v12 = vld [vmem:[%s3633_s3] sm:$0xff]  ;;  %vm3136_vm2 = vmpackc.low %vm1136_vm1, %vm1136_vm1 }
  0x2a   :  { %2051 = vmatprep.mubr.msk.f32.mxu1 %vm1136_vm1, %v1122_v12 }
  0x2c   :  { %2124 = vmatmul.mubr.msk.f32.gmra.mrb[16].mxu0 %vm96_vm0, %v38_v23 }
  0x2d   :  { %2126 = vmatprep.mubr.msk.f32.mxu0 %vm96_vm0, %v39_v24 }
  0x30   :  { %2127 = vmatmul.mubr.msk.f32.gmra.mrb[18].mxu0 %vm96_vm0, %v40_v25 }
  0x31   :  { %2129 = vmatprep.mubr.msk.f32.mxu0 %vm96_vm0, %v41_v26 }
  0x34   :  { %2130 = vmatmul.mubr.msk.f32.gmra.mrb[20].mxu0 %vm96_vm0, %v42_v27 }
  0x35   :  { %2132 = vmatprep.mubr.msk.f32.mxu0 %vm96_vm0, %v43_v28 }
  0x38   :  { %2133 = vmatmul.mubr.msk.f32.gmra.mrb[22].mxu0 %vm96_vm0, %v44_v29 }
  0x39   :  { %2135 = vmatprep.mubr.msk.f32.mxu0 %vm96_vm0, %v45_v30 }
  0x3c   :  { %2136 = vmatmul.mubr.msk.f32.gmra.mrb[24].mxu0 %vm96_vm0, %v46_v31 }
  0x3d   :  { %2138 = vmatprep.mubr.msk.f32.mxu0 %vm96_vm0, %v47_v32 }
  0x40   :  { %2139 = vmatmul.mubr.msk.f32.gmra.mrb[26].mxu0 %vm96_vm0, %v48_v33 }
  0x41   :  { %2141 = vmatprep.mubr.msk.f32.mxu0 %vm96_vm0, %v49_v34 }
  0x44   :  { %2142 = vmatmul.mubr.msk.f32.gmra.mrb[28].mxu0 %vm96_vm0, %v50_v35 }
  0x45   :  { %2144 = vmatprep.mubr.msk.f32.mxu0 %vm96_vm0, %v51_v36 }
  0x48   :  { %2145 = vmatmul.mubr.msk.f32.gmra.mrb[30].mxu0 %vm96_vm0, %v52_v37 }
  0x49   :  { %2147 = vmatprep.mubr.msk.f32.mxu0 %vm96_vm0, %v53_v38 }
  0x4c   :  { %2148 = vmatmul.mubr.msk.f32.gmra.mrb[32].mxu0 %vm96_vm0, %v54_v39 }
  0x4d   :  { %2150 = vmatprep.mubr.msk.f32.mxu0 %vm96_vm0, %v55_v40 }
  0x50   :  { %2151 = vmatmul.mubr.msk.f32.gmra.mrb[34].mxu0 %vm96_vm0, %v56_v41 }
  0x51   :  { %2153 = vmatprep.mubr.msk.f32.mxu0 %vm96_vm0, %v57_v42 }
  0x54   :  { %2154 = vmatmul.mubr.msk.f32.gmra.mrb[36].mxu0 %vm96_vm0, %v58_v43 }
  0x55   :  { %2156 = vmatprep.mubr.msk.f32.mxu0 %vm96_vm0, %v59_v44 }
  0x58   :  { %2157 = vmatmul.mubr.msk.f32.gmra.mrb[38].mxu0 %vm96_vm0, %v60_v45 }
  0x59   :  { %2159 = vmatprep.mubr.msk.f32.mxu0 %vm96_vm0, %v61_v46 }
  0x5c   :  { %2160 = vmatmul.mubr.msk.f32.gmra.mrb[40].mxu0 %vm96_vm0, %v62_v47 }
  0x5d   :  { %2162 = vmatprep.mubr.msk.f32.mxu0 %vm96_vm0, %v63_v48 }
  0x60   :  { %2163 = vmatmul.mubr.msk.f32.gmra.mrb[42].mxu0 %vm96_vm0, %v64_v49 }
  0x61   :  { %2165 = vmatprep.mubr.msk.f32.mxu0 %vm96_vm0, %v65_v50 }
  0x64   :  { %2166 = vmatmul.mubr.msk.f32.gmra.mrb[44].mxu0 %vm96_vm0, %v66_v51 }
  0x65   :  { %2168 = vmatprep.mubr.msk.f32.mxu0 %vm96_vm0, %v67_v52 }
  0x68   :  { %2169 = vmatmul.mubr.msk.f32.gmra.mrb[46].mxu0 %vm96_vm0, %v68_v53 }
  0x69   :  { %2171 = vmatprep.mubr.msk.f32.mxu0 %vm96_vm0, %v69_v54 }
  0x6c   :  { %2172 = vmatmul.mubr.msk.f32.gmra.mrb[48].mxu0 %vm96_vm0, %v70_v55 }
  0x6d   :  { %2174 = vmatprep.mubr.msk.f32.mxu0 %vm96_vm0, %v71_v56 }
  0x70   :  { %2175 = vmatmul.mubr.msk.f32.gmra.mrb[50].mxu0 %vm96_vm0, %v72_v57 }
  0x71   :  { %2177 = vmatprep.mubr.msk.f32.mxu0 %vm96_vm0, %v73_v58 }
  0x74   :  { %2178 = vmatmul.mubr.msk.f32.gmra.mrb[52].mxu0 %vm96_vm0, %v74_v59 }
  0x75   :  { %2180 = vmatprep.mubr.msk.f32.mxu0 %vm96_vm0, %v75_v60 }
  0x78   :  { %2181 = vmatmul.mubr.msk.f32.gmra.mrb[54].mxu0 %vm96_vm0, %v76_v61 }
  0x79   :  { %2183 = vmatprep.mubr.msk.f32.mxu0 %vm96_vm0, %v77_v62 }
  0x7c   :  { %2184 = vmatmul.mubr.msk.f32.gmra.mrb[56].mxu0 %vm96_vm0, %v78_v63 }
  0x7d   :  { %2186 = vmatprep.mubr.msk.f32.mxu0 %vm96_vm0, %v79_v0 }
  0x80   :  { %2187 = vmatmul.mubr.msk.f32.gmra.mrb[58].mxu0 %vm96_vm0, %v80_v1 }
  0x81   :  { %2189 = vmatprep.mubr.msk.f32.mxu0 %vm96_vm0, %v81_v2 }
  0x84   :  { %2190 = vmatmul.mubr.msk.f32.gmra.mrb[60].mxu0 %vm96_vm0, %v82_v3 }
  0x85   :  { %2192 = vmatprep.mubr.msk.f32.mxu0 %vm96_vm0, %v83_v4 }
  0x88   :  { %2193 = vmatmul.mubr.msk.f32.gmra.mrb[62].mxu0 %vm96_vm0, %v84_v5 }
  0xdf   :  { %v2101_v7 = vpop.f32.mrb[0].mxu0 }
  0xe0   :  { %v2934_v8 = vadd.f32 %v2101_v7, %v2931_v6  ;;  %v355_v9 = vpop.f32.mrb[1].mxu0 }
  0xe1   :  { %v2937_v10 = vadd.f32 %v2931_v6, %v355_v9 }
  0xe2   :  { %v1812_v11 = vmul.f32 -1.442695, %v2934_v8 }
  0xe3   :  { %v1811_v13 = vmul.f32 -1.442695, %v2937_v10  ;;  %v2104_v14 = vpop.f32.mrb[2].mxu0 }
  0xe4   :  { %2304 = vpow2.f32 %v1812_v11  ;;  %v2946_v15 = vadd.f32 %v2104_v14, %v2931_v6  ;;  %v365_v16 = vpop.f32.mrb[3].mxu0 }
  0xe5   :  { %2306 = vpow2.f32 %v1811_v13  ;;  %v2949_v17 = vadd.f32 %v2931_v6, %v365_v16 }
  0xe6   :  { %v1814_v18 = vmul.f32 -1.442695, %v2946_v15 }
  0xe7   :  { %v1813_v19 = vmul.f32 -1.442695, %v2949_v17  ;;  %v2107_v20 = vpop.f32.mrb[4].mxu0 }
  0xe8   :  { %2308 = vpow2.f32 %v1814_v18  ;;  %v2954_v21 = vadd.f32 %v2107_v20, %v2931_v6  ;;  %v375_v22 = vpop.f32.mrb[5].mxu0 }
  0xe9   :  { %2310 = vpow2.f32 %v1813_v19  ;;  %v2957_v23 = vadd.f32 %v2931_v6, %v375_v22 }
  0xea   :  { %v1816_v24 = vmul.f32 -1.442695, %v2954_v21 }
  0xeb   :  { %v1815_v25 = vmul.f32 -1.442695, %v2957_v23  ;;  %v2110_v26 = vpop.f32.mrb[6].mxu0 }
  0xec   :  { %2312 = vpow2.f32 %v1816_v24  ;;  %v2962_v27 = vadd.f32 %v2110_v26, %v2931_v6  ;;  %v385_v28 = vpop.f32.mrb[7].mxu0 }
  0xed   :  { %2314 = vpow2.f32 %v1815_v25  ;;  %v2965_v29 = vadd.f32 %v2931_v6, %v385_v28 }
  0xee   :  { %v2305_v30 = vpop.eup %2304  ;;  %v1818_v31 = vmul.f32 -1.442695, %v2962_v27 }
  0xef   :  { %v2307_v32 = vpop.eup %2306  ;;  %v867_v33 = vadd.f32 1.0, %v2305_v30  ;;  %v1817_v34 = vmul.f32 -1.442695, %v2965_v29  ;;  %v2113_v35 = vpop.f32.mrb[8].mxu0 }
  0xf0   :  { %v866_v36 = vadd.f32 1.0, %v2307_v32  ;;  %2316 = vpow2.f32 %v1818_v31  ;;  %v2970_v37 = vadd.f32 %v2113_v35, %v2931_v6  ;;  %v395_v38 = vpop.f32.mrb[9].mxu0 }
  0xf1   :  { %2318 = vrcp.f32 %v867_v33  ;;  %v2973_v39 = vadd.f32 %v2931_v6, %v395_v38 }
  0xf2   :  { %v2309_v40 = vpop.eup %2308  ;;  %2320 = vrcp.f32 %v866_v36  ;;  %v1820_v41 = vmul.f32 -1.442695, %v2970_v37 }
  0xf3   :  { %v2311_v42 = vpop.eup %2310  ;;  %v869_v43 = vadd.f32 1.0, %v2309_v40  ;;  %2322 = vpow2.f32 %v1817_v34  ;;  %v1819_v44 = vmul.f32 -1.442695, %v2973_v39  ;;  %v2116_v45 = vpop.f32.mrb[10].mxu0 }
  0xf4   :  { %v868_v46 = vadd.f32 1.0, %v2311_v42  ;;  %2324 = vpow2.f32 %v1820_v41  ;;  %v2978_v47 = vadd.f32 %v2116_v45, %v2931_v6  ;;  %v405_v48 = vpop.f32.mrb[11].mxu0 }
  0xf5   :  { %2326 = vrcp.f32 %v869_v43  ;;  %v2981_v49 = vadd.f32 %v2931_v6, %v405_v48 }
  0xf6   :  { %v2313_v50 = vpop.eup %2312  ;;  %2328 = vrcp.f32 %v868_v46  ;;  %v1822_v51 = vmul.f32 -1.442695, %v2978_v47 }
  0xf7   :  { %v2315_v52 = vpop.eup %2314  ;;  %v871_v53 = vadd.f32 1.0, %v2313_v50  ;;  %2330 = vpow2.f32 %v1819_v44  ;;  %v1821_v54 = vmul.f32 -1.442695, %v2981_v49  ;;  %v2119_v55 = vpop.f32.mrb[12].mxu0 }
  0xf8   :  { %v870_v56 = vadd.f32 1.0, %v2315_v52  ;;  %2332 = vpow2.f32 %v1822_v51  ;;  %v2986_v57 = vadd.f32 %v2119_v55, %v2931_v6  ;;  %v415_v58 = vpop.f32.mrb[13].mxu0 }
  0xf9   :  { %2334 = vrcp.f32 %v871_v53  ;;  %v2989_v59 = vadd.f32 %v2931_v6, %v415_v58 }
  0xfa   :  { %v2317_v60 = vpop.eup %2316  ;;  %2336 = vrcp.f32 %v870_v56  ;;  %v1824_v61 = vmul.f32 -1.442695, %v2986_v57 }
  0xfb   :  { %v2319_v62 = vpop.eup %2318  ;;  %v873_v63 = vadd.f32 1.0, %v2317_v60  ;;  %2338 = vpow2.f32 %v1821_v54  ;;  %v1823_v0 = vmul.f32 -1.442695, %v2989_v59  ;;  %v2122_v1 = vpop.f32.mrb[14].mxu0 }
  0xfc   :  { %v2321_v2 = vpop.eup %2320  ;;  %v2994_v3 = vmul.f32 %v2319_v62, %v2934_v8  ;;  %2340 = vpow2.f32 %v1824_v61  ;;  %v2997_v4 = vadd.f32 %v2122_v1, %v2931_v6  ;;  %v425_v5 = vpop.f32.mrb[15].mxu0 }
  0xfd   :  { %v2323_v7 = vpop.eup %2322  ;;  %v3000_v9 = vmul.f32 %v2321_v2, %v2937_v10  ;;  %2342 = vrcp.f32 %v873_v63  ;;  %v3003_v11 = vadd.f32 %v2931_v6, %v425_v5 }
  0xfe   :  { %v2325_v12 = vpop.eup %2324  ;;  %v872_v13 = vadd.f32 1.0, %v2323_v7  ;;  %2344 = vpow2.f32 %v1823_v0  ;;  %v1826_v14 = vmul.f32 -1.442695, %v2997_v4 }
  0xff   :  { %v2327_v8 = vpop.eup %2326  ;;  %v875_v16 = vadd.f32 1.0, %v2325_v12  ;;  %v1825_v18 = vmul.f32 -1.442695, %v3003_v11  ;;  %v2125_v19 = vpop.f32.mrb[16].mxu0  ;;  %v2206_v20 = vpack.c.bf16 %v2994_v3, %v3000_v9 }
 0x100   :  { %v2329_v22 = vpop.eup %2328  ;;  %v3010_v10 = vmul.f32 %v2327_v8, %v2946_v15  ;;  %2346 = vrcp.f32 %v872_v13  ;;  %v3013_v24 = vadd.f32 %v2125_v19, %v2931_v6  ;;  %v435_v25 = vpop.f32.mrb[17].mxu0 }
 0x101   :  { %v2331_v26 = vpop.eup %2330  ;;  %v3016_v28 = vmul.f32 %v2329_v22, %v2949_v17  ;;  %2348 = vrcp.f32 %v875_v16  ;;  %v3019_v30 = vadd.f32 %v2931_v6, %v435_v25 }
 0x102   :  { %v2333_v31 = vpop.eup %2332  ;;  %v874_v32 = vadd.f32 1.0, %v2331_v26  ;;  %2350 = vpow2.f32 %v1826_v14  ;;  %v1828_v33 = vmul.f32 -1.442695, %v3013_v24 }
 0x103   :  { %v2335_v15 = vpop.eup %2334  ;;  %v2212_v34 = vpack.c.bf16 %v3010_v10, %v3016_v28  ;;  %v877_v35 = vadd.f32 1.0, %v2333_v31  ;;  %2352 = vpow2.f32 %v1825_v18  ;;  %v1827_v36 = vmul.f32 -1.442695, %v3019_v30  ;;  %v2128_v38 = vpop.f32.mrb[18].mxu0 }
 0x104   :  { %v2337_v17 = vpop.eup %2336  ;;  %v3026_v40 = vmul.f32 %v2335_v15, %v2954_v21  ;;  %2354 = vrcp.f32 %v874_v32  ;;  %v3029_v41 = vadd.f32 %v2128_v38, %v2931_v6  ;;  %v445_v42 = vpop.f32.mrb[19].mxu0 }
 0x105   :  { %v2339_v43 = vpop.eup %2338  ;;  %v3032_v44 = vmul.f32 %v2337_v17, %v2957_v23  ;;  %2356 = vrcp.f32 %v877_v35  ;;  %v3035_v45 = vadd.f32 %v2931_v6, %v445_v42 }
 0x106   :  { %v2341_v46 = vpop.eup %2340  ;;  %v876_v48 = vadd.f32 1.0, %v2339_v43  ;;  %2358 = vpow2.f32 %v1828_v33  ;;  %v1830_v50 = vmul.f32 -1.442695, %v3029_v41 }
 0x107   :  { %v2343_v21 = vpop.eup %2342  ;;  %v2218_v51 = vpack.c.bf16 %v3026_v40, %v3032_v44  ;;  %v879_v52 = vadd.f32 1.0, %v2341_v46  ;;  %2360 = vpow2.f32 %v1827_v36  ;;  %v2131_v53 = vpop.f32.mrb[20].mxu0  ;;  %v1829_v23 = vmul.f32 -1.442695, %v3035_v45 }
 0x108   :  { %v2345_v54 = vpop.eup %2344  ;;  %2362 = vrcp.f32 %v876_v48  ;;  %v3042_v55 = vadd.f32 %v2131_v53, %v2931_v6  ;;  %v455_v56 = vpop.f32.mrb[21].mxu0  ;;  %v3045_v58 = vmul.f32 %v2343_v21, %v2962_v27 }
 0x109   :  { %2364 = vrcp.f32 %v879_v52  ;;  %v878_v60 = vadd.f32 1.0, %v2345_v54  ;;  %v3048_v61 = vadd.f32 %v2931_v6, %v455_v56 }
 0x10a   :  { %v2347_v62 = vpop.eup %2346  ;;  %2366 = vpow2.f32 %v1830_v50  ;;  %v1832_v63 = vmul.f32 -1.442695, %v3042_v55 }
 0x10b   :  { %v2349_v0 = vpop.eup %2348  ;;  %v3052_v1 = vmul.f32 %v2347_v62, %v2965_v29  ;;  %2368 = vrcp.f32 %v878_v60  ;;  %v1831_v2 = vmul.f32 -1.442695, %v3048_v61  ;;  %v2134_v5 = vpop.f32.mrb[22].mxu0 }
 0x10c   :  { %v2351_v7 = vpop.eup %2350  ;;  %v3056_v27 = vmul.f32 %v2349_v0, %v2970_v37  ;;  %2370 = vpow2.f32 %v1829_v23  ;;  %v3059_v12 = vadd.f32 %v2134_v5, %v2931_v6  ;;  %v465_v13 = vpop.f32.mrb[23].mxu0 }
 0x10d   :  { %v2353_v14 = vpop.eup %2352  ;;  %v2224_v8 = vpack.c.bf16 %v3045_v58, %v3052_v1  ;;  %v881_v16 = vadd.f32 1.0, %v2351_v7  ;;  %2372 = vpow2.f32 %v1832_v63  ;;  %v3064_v29 = vadd.f32 %v2931_v6, %v465_v13 }
 0x10e   :  { %v2355_v18 = vpop.eup %2354  ;;  %v880_v19 = vadd.f32 1.0, %v2353_v14  ;;  %2374 = vpow2.f32 %v1831_v2  ;;  %v1834_v37 = vmul.f32 -1.442695, %v3059_v12 }
 0x10f   :  { %v2357_v22 = vpop.eup %2356  ;;  %v3068_v25 = vmul.f32 %v2355_v18, %v2973_v39  ;;  %2376 = vrcp.f32 %v881_v16  ;;  %v1833_v26 = vmul.f32 -1.442695, %v3064_v29  ;;  %v2137_v31 = vpop.f32.mrb[24].mxu0 }
 0x110   :  { %v2359_v32 = vpop.eup %2358  ;;  %v3072_v33 = vmul.f32 %v2357_v22, %v2978_v47  ;;  %2378 = vrcp.f32 %v880_v19  ;;  %v3075_v15 = vadd.f32 %v2137_v31, %v2931_v6  ;;  %v475_v35 = vpop.f32.mrb[25].mxu0 }
 0x111   :  { %v2361_v36 = vpop.eup %2360  ;;  %v2230_v38 = vpack.c.bf16 %v3056_v27, %v3068_v25  ;;  %v883_v17 = vadd.f32 1.0, %v2359_v32  ;;  %2380 = vpow2.f32 %v1834_v37  ;;  %v3080_v39 = vadd.f32 %v2931_v6, %v475_v35 }
 0x112   :  { %v2363_v42 = vpop.eup %2362  ;;  %v882_v43 = vadd.f32 1.0, %v2361_v36  ;;  %2382 = vpow2.f32 %v1833_v26  ;;  %v1836_v47 = vmul.f32 -1.442695, %v3075_v15 }
 0x113   :  { %v2365_v46 = vpop.eup %2364  ;;  %v3084_v48 = vmul.f32 %v2363_v42, %v2981_v49  ;;  %2384 = vrcp.f32 %v883_v17  ;;  %v1835_v50 = vmul.f32 -1.442695, %v3080_v39  ;;  %v2140_v21 = vpop.f32.mrb[26].mxu0 }
 0x114   :  { %v2367_v52 = vpop.eup %2366  ;;  %v3088_v53 = vmul.f32 %v2365_v46, %v2986_v57  ;;  %2386 = vrcp.f32 %v882_v43  ;;  %v3091_v54 = vadd.f32 %v2140_v21, %v2931_v6  ;;  %v485_v23 = vpop.f32.mrb[27].mxu0 }
 0x115   :  { %v2369_v56 = vpop.eup %2368  ;;  %v2236_v60 = vpack.c.bf16 %v3072_v33, %v3084_v48  ;;  %v885_v62 = vadd.f32 1.0, %v2367_v52  ;;  %2388 = vpow2.f32 %v1836_v47  ;;  %v3096_v49 = vadd.f32 %v2931_v6, %v485_v23 }
 0x116   :  { %v2371_v63 = vpop.eup %2370  ;;  %v3099_v0 = vmul.f32 %v2369_v56, %v2989_v59  ;;  %2390 = vpow2.f32 %v1835_v50  ;;  %v1838_v57 = vmul.f32 -1.442695, %v3091_v54 }
 0x117   :  { %v2373_v2 = vpop.eup %2372  ;;  %2392 = vrcp.f32 %v885_v62  ;;  %v884_v5 = vadd.f32 1.0, %v2371_v63  ;;  %v1837_v7 = vmul.f32 -1.442695, %v3096_v49  ;;  %v2143_v13 = vpop.f32.mrb[28].mxu0 }
 0x118   :  { %v2375_v14 = vpop.eup %2374  ;;  %v2242_v16 = vpack.c.bf16 %v3088_v53, %v3099_v0  ;;  %v887_v18 = vadd.f32 1.0, %v2373_v2  ;;  %2394 = vpow2.f32 %v1838_v57  ;;  %v3106_v19 = vadd.f32 %v2143_v13, %v2931_v6  ;;  %v495_v59 = vpop.f32.mrb[29].mxu0 }
 0x119   :  { %v2377_v37 = vpop.eup %2376  ;;  %2396 = vrcp.f32 %v884_v5  ;;  %v886_v22 = vadd.f32 1.0, %v2375_v14  ;;  %v3109_v26 = vadd.f32 %v2931_v6, %v495_v59 }
 0x11a   :  { %v2379_v31 = vpop.eup %2378  ;;  %v3112_v32 = vmul.f32 %v2377_v37, %v2997_v4  ;;  %2398 = vrcp.f32 %v887_v18  ;;  %v1840_v35 = vmul.f32 -1.442695, %v3106_v19 }
 0x11b   :  { %v2381_v36 = vpop.eup %2380  ;;  %v3116_v17 = vmul.f32 %v2379_v31, %v3003_v11  ;;  %2400 = vrcp.f32 %v886_v22  ;;  %v2146_v42 = vpop.f32.mrb[30].mxu0  ;;  %v1839_v46 = vmul.f32 -1.442695, %v3109_v26 }
 0x11c   :  { %v2383_v43 = vpop.eup %2382  ;;  %v889_v47 = vadd.f32 1.0, %v2381_v36  ;;  %2402 = vpow2.f32 %v1837_v7  ;;  %v3120_v50 = vadd.f32 %v2146_v42, %v2931_v6  ;;  %v505_v21 = vpop.f32.mrb[31].mxu0 }
 0x11d   :  { %v2385_v4 = vpop.eup %2384  ;;  %v2248_v52 = vpack.c.bf16 %v3112_v32, %v3116_v17  ;;  %v888_v23 = vadd.f32 1.0, %v2383_v43  ;;  %2404 = vpow2.f32 %v1840_v35  ;;  %v3125_v11 = vadd.f32 %v2931_v6, %v505_v21 }
 0x11e   :  { %v2387_v56 = vpop.eup %2386  ;;  %v1075_v62 = vmul.f32 %v2385_v4, %v3013_v24  ;;  %2406 = vrcp.f32 %v889_v47  ;;  %v1842_v63 = vmul.f32 -1.442695, %v3120_v50 }
 0x11f   :  { %v2389_v57 = vpop.eup %2388  ;;  %v1074_v2 = vmul.f32 %v2387_v56, %v3019_v30  ;;  %2408 = vrcp.f32 %v888_v23  ;;  %v2149_v5 = vpop.f32.mrb[32].mxu0  ;;  %v1841_v14 = vmul.f32 -1.442695, %v3125_v11 }
 0x120   :  { %v2391_v7 = vpop.eup %2390  ;;  %v891_v13 = vadd.f32 1.0, %v2389_v57  ;;  %2410 = vpow2.f32 %v1839_v46  ;;  %v3132_v18 = vadd.f32 %v2149_v5, %v2931_v6  ;;  %v515_v59 = vpop.f32.mrb[33].mxu0 }
 0x121   :  { %v2393_v37 = vpop.eup %2392  ;;  %v890_v22 = vadd.f32 1.0, %v2391_v7  ;;  %2412 = vpow2.f32 %v1842_v63  ;;  %v3141_v30 = vadd.f32 %v2931_v6, %v515_v59  ;;  %v2203_v31 = vpack.c.bf16 %v1075_v62, %v1074_v2 }
 0x122   :  { %v2395_v35 = vpop.eup %2394  ;;  %v1077_v36 = vmul.f32 %v2393_v37, %v3029_v41  ;;  %2414 = vrcp.f32 %v891_v13  ;;  %v1844_v42 = vmul.f32 -1.442695, %v3132_v18 }
 0x123   :  { %v2397_v43 = vpop.eup %2396  ;;  %2416 = vrcp.f32 %v890_v22  ;;  %v893_v47 = vadd.f32 1.0, %v2395_v35  ;;  %v1843_v46 = vmul.f32 -1.442695, %v3141_v30  ;;  %2205 = vmatprep.subr.msk.bf16.mxu1 %vm3136_vm2, %v2203_v31  ;;  %v2152_v21 = vpop.f32.mrb[34].mxu0  ;;  %v2626_v31 = vmov 0  }
 0x124   :  { %v2399_v4 = vpop.eup %2398  ;;  %v1076_v23 = vmul.f32 %v2397_v43, %v3035_v45  ;;  %2418 = vpow2.f32 %v1841_v14  ;;  %2208 = vmatpush3.bf16.xpose.msk.msra.mxu1 %vm3136_vm2, %v2206_v20  ;;  %v3155_v41 = vadd.f32 %v2152_v21, %v2931_v6  ;;  %v525_v56 = vpop.f32.mrb[35].mxu0  ;;  %2303 = vset.pattern.permute.xlu0 %v2626_v31  ;;  %v1125_v21 = vld [vmem:[%s3634_s4 + $0x8] sm:$0x3f] }
 0x125   :  { %v2401_v62 = vpop.eup %2400  ;;  %v1079_v63 = vmul.f32 %v2399_v4, %v3042_v55  ;;  %2420 = vrcp.f32 %v893_v47  ;;  %v3159_v57 = vadd.f32 %v2931_v6, %v525_v56  ;;  %v1124_v55 = vld [vmem:[%s3634_s4] sm:$0xff] }
 0x126   :  { %v2403_v2 = vpop.eup %2402  ;;  %v2209_v45 = vpack.c.bf16 %v1077_v36, %v1076_v23  ;;  %v1078_v5 = vmul.f32 %v2401_v62, %v3048_v61  ;;  %2422 = vpow2.f32 %v1844_v42  ;;  %v1846_v3 = vmul.f32 -1.442695, %v3155_v41  ;;  %1128 = vperm.xlu0 %2303, %v1124_v55  }
 0x127   :  { %v2405_v9 = vpop.eup %2404  ;;  %v892_v20 = vadd.f32 1.0, %v2403_v2  ;;  %2424 = vpow2.f32 %v1843_v46  ;;  %v1845_v7 = vmul.f32 -1.442695, %v3159_v57  ;;  %v2155_v13 = vpop.f32.mrb[36].mxu0 }
 0x128   :  { %v2407_v14 = vpop.eup %2406  ;;  %v2215_v59 = vpack.c.bf16 %v1079_v63, %v1078_v5  ;;  %v895_v37 = vadd.f32 1.0, %v2405_v9  ;;  %2426 = vpow2.f32 %v1846_v3  ;;  %2211 = vmatprep.subr.msk.bf16.mxu1 %vm3136_vm2, %v2209_v45  ;;  %v3170_v61 = vadd.f32 %v2155_v13, %v2931_v6  ;;  %v535_v22 = vpop.f32.mrb[37].mxu0 }
 0x129   :  { %v2409_v35 = vpop.eup %2408  ;;  %v3173_v36 = vmul.f32 %v2407_v14, %v3059_v12  ;;  %2428 = vrcp.f32 %v892_v20  ;;  %v3176_v42 = vadd.f32 %v2931_v6, %v535_v22 }
 0x12a   :  { %v2411_v43 = vpop.eup %2410  ;;  %v1080_v47 = vmul.f32 %v2409_v35, %v3064_v29  ;;  %2430 = vrcp.f32 %v895_v37  ;;  %v1848_v46 = vmul.f32 -1.442695, %v3170_v61  ;;  %1133 = vperm.xlu0 %2303, %v1125_v21  }
 0x12b   :  { %v2413_v4 = vpop.eup %2412  ;;  %v894_v23 = vadd.f32 1.0, %v2411_v43  ;;  %2432 = vpow2.f32 %v1845_v7  ;;  %v1847_v12 = vmul.f32 -1.442695, %v3176_v42  ;;  %v2158_v56 = vpop.f32.mrb[38].mxu0 }
 0x12c   :  { %v2415_v62 = vpop.eup %2414  ;;  %v2221_v63 = vpack.c.bf16 %v3173_v36, %v1080_v47  ;;  %v897_v2 = vadd.f32 1.0, %v2413_v4  ;;  %2434 = vpow2.f32 %v1848_v46  ;;  %2214 = vmatpush3.bf16.xpose.msk.msra.mxu1 %vm3136_vm2, %v2212_v34  ;;  %v3191_v29 = vadd.f32 %v2158_v56, %v2931_v6  ;;  %v545_v45 = vpop.f32.mrb[39].mxu0 }
 0x12d   :  { %v2417_v5 = vpop.eup %2416  ;;  %v3194_v3 = vmul.f32 %v2415_v62, %v3075_v15  ;;  %2436 = vrcp.f32 %v894_v23  ;;  %2217 = vmatprep.subr.msk.bf16.mxu1 %vm3136_vm2, %v2215_v59  ;;  %v3199_v9 = vadd.f32 %v2931_v6, %v545_v45 }
 0x12e   :  { %v2419_v10 = vpop.eup %2418  ;;  %v3202_v28 = vmul.f32 %v2417_v5, %v3080_v39  ;;  %2438 = vrcp.f32 %v897_v2  ;;  %v1850_v34 = vmul.f32 -1.442695, %v3191_v29 }
 0x12f   :  { %v2421_v20 = vpop.eup %2420  ;;  %v896_v7 = vadd.f32 1.0, %v2419_v10  ;;  %2440 = vpow2.f32 %v1847_v12  ;;  %v1849_v15 = vmul.f32 -1.442695, %v3199_v9  ;;  %v2161_v13 = vpop.f32.mrb[40].mxu0 }
 0x130   :  { %v2423_v55 = vpop.eup %2422  ;;  %v2227_v14 = vpack.c.bf16 %v3194_v3, %v3202_v28  ;;  %2442 = vpow2.f32 %v1850_v34  ;;  %v3209_v59 = vadd.f32 %v2161_v13, %v2931_v6  ;;  %v555_v37 = vpop.f32.mrb[41].mxu0  ;;  %v3215_v36 = vmul.f32 %v2421_v20, %v3091_v54 }
 0x131   :  { %v2425_v39 = vpop.eup %2424  ;;  %2444 = vrcp.f32 %v896_v7  ;;  %v899_v22 = vadd.f32 1.0, %v2423_v55  ;;  %v3212_v31 = vadd.f32 %v2931_v6, %v555_v37 }
 0x132   :  { %v2427_v35 = vpop.eup %2426  ;;  %v898_v43 = vadd.f32 1.0, %v2425_v39  ;;  %2446 = vpow2.f32 %v1849_v15  ;;  %v1852_v47 = vmul.f32 -1.442695, %v3209_v59 }
 0x133   :  { %v2429_v46 = vpop.eup %2428  ;;  %2448 = vrcp.f32 %v899_v22  ;;  %v901_v21 = vadd.f32 1.0, %v2427_v35  ;;  %v1851_v4 = vmul.f32 -1.442695, %v3212_v31  ;;  %v2164_v23 = vpop.f32.mrb[42].mxu0 }
 0x134   :  { %v2431_v12 = vpop.eup %2430  ;;  %v3220_v56 = vmul.f32 %v2429_v46, %v3096_v49  ;;  %2450 = vrcp.f32 %v898_v43  ;;  %2220 = vmatpush3.bf16.xpose.msk.msra.mxu1 %vm3136_vm2, %v2218_v51  ;;  %v3228_v54 = vadd.f32 %v2164_v23, %v2931_v6  ;;  %v565_v62 = vpop.f32.mrb[43].mxu0 }
 0x135   :  { %v2433_v2 = vpop.eup %2432  ;;  %v3231_v45 = vmul.f32 %v2431_v12, %v3106_v19  ;;  %2452 = vrcp.f32 %v901_v21  ;;  %2223 = vmatprep.subr.msk.bf16.mxu1 %vm3136_vm2, %v2221_v63  ;;  %v3236_v49 = vadd.f32 %v2931_v6, %v565_v62 }
 0x136   :  { %v2435_v5 = vpop.eup %2434  ;;  %v2233_v40 = vpack.c.bf16 %v3215_v36, %v3220_v56  ;;  %v900_v44 = vadd.f32 1.0, %v2433_v2  ;;  %2454 = vpow2.f32 %v1852_v47  ;;  %v1854_v51 = vmul.f32 -1.442695, %v3228_v54 }
 0x137   :  { %v2437_v10 = vpop.eup %2436  ;;  %v903_v34 = vadd.f32 1.0, %v2435_v5  ;;  %2456 = vpow2.f32 %v1851_v4  ;;  %v1853_v19 = vmul.f32 -1.442695, %v3236_v49  ;;  %v2167_v20 = vpop.f32.mrb[44].mxu0 }
 0x138   :  { %v2439_v7 = vpop.eup %2438  ;;  %v3243_v63 = vmul.f32 %v2437_v10, %v3109_v26  ;;  %2458 = vrcp.f32 %v900_v44  ;;  %v3246_v15 = vadd.f32 %v2167_v20, %v2931_v6  ;;  %v575_v13 = vpop.f32.mrb[45].mxu0 }
 0x139   :  { %v2441_v55 = vpop.eup %2440  ;;  %v3249_v37 = vmul.f32 %v2439_v7, %v3120_v50  ;;  %2460 = vrcp.f32 %v903_v34  ;;  %v3252_v39 = vadd.f32 %v2931_v6, %v575_v13 }
 0x13a   :  { %v2443_v22 = vpop.eup %2442  ;;  %v2239_v35 = vpack.c.bf16 %v3231_v45, %v3243_v63  ;;  %v902_v43 = vadd.f32 1.0, %v2441_v55  ;;  %2462 = vpow2.f32 %v1854_v51  ;;  %v1856_v26 = vmul.f32 -1.442695, %v3246_v15 }
 0x13b   :  { %v2445_v47 = vpop.eup %2444  ;;  %v905_v46 = vadd.f32 1.0, %v2443_v22  ;;  %2464 = vpow2.f32 %v1853_v19  ;;  %v2170_v21 = vpop.f32.mrb[46].mxu0  ;;  %v1855_v23 = vmul.f32 -1.442695, %v3252_v39 }
 0x13c   :  { %v2447_v4 = vpop.eup %2446  ;;  %v3258_v50 = vmul.f32 %v2445_v47, %v3125_v11  ;;  %2466 = vrcp.f32 %v902_v43  ;;  %2226 = vmatpush3.bf16.xpose.msk.msra.mxu1 %vm3136_vm2, %v2224_v8  ;;  %v3267_v12 = vadd.f32 %v2170_v21, %v2931_v6  ;;  %v585_v62 = vpop.f32.mrb[47].mxu0 }
 0x13d   :  { %v2449_v2 = vpop.eup %2448  ;;  %2468 = vrcp.f32 %v905_v46  ;;  %v904_v5 = vadd.f32 1.0, %v2447_v4  ;;  %2229 = vmatprep.subr.msk.bf16.mxu1 %vm3136_vm2, %v2227_v14  ;;  %v3275_v11 = vadd.f32 %v2931_v6, %v585_v62 }
 0x13e   :  { %v2451_v58 = vpop.eup %2450  ;;  %v2245_v1 = vpack.c.bf16 %v3249_v37, %v3258_v50  ;;  %v3280_v8 = vmul.f32 %v2449_v2, %v3132_v18  ;;  %2470 = vpow2.f32 %v1856_v26  ;;  %v1858_v44 = vmul.f32 -1.442695, %v3267_v12 }
 0x13f   :  { %v2453_v51 = vpop.eup %2452  ;;  %v3284_v10 = vmul.f32 %v2451_v58, %v3141_v30  ;;  %2472 = vrcp.f32 %v904_v5  ;;  %v1857_v3 = vmul.f32 -1.442695, %v3275_v11  ;;  %v2173_v28 = vpop.f32.mrb[48].mxu0 }
 0x140   :  { %v2455_v14 = vpop.eup %2454  ;;  %v3288_v34 = vmul.f32 %v2453_v51, %v3155_v41  ;;  %2474 = vpow2.f32 %v1855_v23  ;;  %v3291_v19 = vadd.f32 %v2173_v28, %v2931_v6  ;;  %v595_v18 = vpop.f32.mrb[49].mxu0 }
 0x141   :  { %v2457_v20 = vpop.eup %2456  ;;  %v2254_v7 = vpack.c.bf16 %v3280_v8, %v3284_v10  ;;  %v907_v13 = vadd.f32 1.0, %v2455_v14  ;;  %2476 = vpow2.f32 %v1858_v44  ;;  %v3296_v30 = vadd.f32 %v2931_v6, %v595_v18 }
 0x142   :  { %v2459_v55 = vpop.eup %2458  ;;  %v906_v22 = vadd.f32 1.0, %v2457_v20  ;;  %2478 = vpow2.f32 %v1857_v3  ;;  %v1860_v41 = vmul.f32 -1.442695, %v3291_v19 }
 0x143   :  { %v2461_v43 = vpop.eup %2460  ;;  %v3300_v26 = vmul.f32 %v2459_v55, %v3159_v57  ;;  %2480 = vrcp.f32 %v907_v13  ;;  %v1859_v47 = vmul.f32 -1.442695, %v3296_v30  ;;  %v2176_v46 = vpop.f32.mrb[50].mxu0 }
 0x144   :  { %v2463_v21 = vpop.eup %2462  ;;  %v3304_v4 = vmul.f32 %v2461_v43, %v3170_v61  ;;  %2482 = vrcp.f32 %v906_v22  ;;  %2232 = vmatpush3.bf16.xpose.msk.msra.mxu1 %vm3136_vm2, %v2230_v38  ;;  %v3312_v23 = vadd.f32 %v2176_v46, %v2931_v6  ;;  %v605_v57 = vpop.f32.mrb[51].mxu0 }
 0x145   :  { %v2465_v62 = vpop.eup %2464  ;;  %v2260_v2 = vpack.c.bf16 %v3288_v34, %v3300_v26  ;;  %v909_v5 = vadd.f32 1.0, %v2463_v21  ;;  %2484 = vpow2.f32 %v1860_v41  ;;  %2235 = vmatprep.subr.msk.bf16.mxu1 %vm3136_vm2, %v2233_v40  ;;  %v3322_v27 = vadd.f32 %v2931_v6, %v605_v57 }
 0x146   :  { %v2467_v25 = vpop.eup %2466  ;;  %v908_v38 = vadd.f32 1.0, %v2465_v62  ;;  %2486 = vpow2.f32 %v1859_v47  ;;  %v1862_v61 = vmul.f32 -1.442695, %v3312_v23 }
 0x147   :  { %v2469_v58 = vpop.eup %2468  ;;  %v3326_v44 = vmul.f32 %v2467_v25, %v3176_v42  ;;  %2488 = vrcp.f32 %v909_v5  ;;  %v1861_v51 = vmul.f32 -1.442695, %v3322_v27  ;;  %v2179_v3 = vpop.f32.mrb[52].mxu0 }
 0x148   :  { %v2471_v36 = vpop.eup %2470  ;;  %v3330_v56 = vmul.f32 %v2469_v58, %v3191_v29  ;;  %2490 = vrcp.f32 %v908_v38  ;;  %v3333_v40 = vadd.f32 %v2179_v3, %v2931_v6  ;;  %v615_v28 = vpop.f32.mrb[53].mxu0 }
 0x149   :  { %v2473_v14 = vpop.eup %2472  ;;  %v2266_v18 = vpack.c.bf16 %v3304_v4, %v3326_v44  ;;  %v911_v20 = vadd.f32 1.0, %v2471_v36  ;;  %2492 = vpow2.f32 %v1862_v61  ;;  %v3338_v42 = vadd.f32 %v2931_v6, %v615_v28 }
 0x14a   :  { %v2475_v13 = vpop.eup %2474  ;;  %v3341_v55 = vmul.f32 %v2473_v14, %v3199_v9  ;;  %2494 = vpow2.f32 %v1861_v51  ;;  %v1864_v29 = vmul.f32 -1.442695, %v3333_v40 }
 0x14b   :  { %v2477_v22 = vpop.eup %2476  ;;  %2496 = vrcp.f32 %v911_v20  ;;  %v910_v41 = vadd.f32 1.0, %v2475_v13  ;;  %v1863_v43 = vmul.f32 -1.442695, %v3338_v42  ;;  %v2182_v47 = vpop.f32.mrb[54].mxu0 }
 0x14c   :  { %v2479_v46 = vpop.eup %2478  ;;  %v2272_v21 = vpack.c.bf16 %v3330_v56, %v3341_v55  ;;  %v913_v57 = vadd.f32 1.0, %v2477_v22  ;;  %2498 = vpow2.f32 %v1864_v29  ;;  %2238 = vmatpush3.bf16.xpose.msk.msra.mxu1 %vm3136_vm2, %v2236_v60  ;;  %v3353_v9 = vadd.f32 %v2182_v47, %v2931_v6  ;;  %v625_v62 = vpop.f32.mrb[55].mxu0 }
 0x14d   :  { %v2481_v5 = vpop.eup %2480  ;;  %2500 = vrcp.f32 %v910_v41  ;;  %v912_v25 = vadd.f32 1.0, %v2479_v46  ;;  %2241 = vmatprep.subr.msk.bf16.mxu1 %vm3136_vm2, %v2239_v35  ;;  %v3361_v38 = vadd.f32 %v2931_v6, %v625_v62 }
 0x14e   :  { %v2483_v33 = vpop.eup %2482  ;;  %v3364_v48 = vmul.f32 %v2481_v5, %v3209_v59  ;;  %2502 = vrcp.f32 %v913_v57  ;;  %v1866_v60 = vmul.f32 -1.442695, %v3353_v9 }
 0x14f   :  { %v2485_v61 = vpop.eup %2484  ;;  %v3368_v58 = vmul.f32 %v2483_v33, %v3212_v31  ;;  %2504 = vrcp.f32 %v912_v25  ;;  %v2185_v51 = vpop.f32.mrb[56].mxu0  ;;  %v1865_v35 = vmul.f32 -1.442695, %v3361_v38 }
 0x150   :  { %v2487_v45 = vpop.eup %2486  ;;  %v915_v63 = vadd.f32 1.0, %v2485_v61  ;;  %2506 = vpow2.f32 %v1863_v43  ;;  %v3372_v3 = vadd.f32 %v2185_v51, %v2931_v6  ;;  %v635_v36 = vpop.f32.mrb[57].mxu0 }
 0x151   :  { %v2489_v59 = vpop.eup %2488  ;;  %v2278_v28 = vpack.c.bf16 %v3364_v48, %v3368_v58  ;;  %v914_v14 = vadd.f32 1.0, %v2487_v45  ;;  %2508 = vpow2.f32 %v1866_v60  ;;  %v3377_v31 = vadd.f32 %v2931_v6, %v635_v36  ;;  %v2600_v6 = vld [vmem:[%s3632_s2] ss:$0 sm:$0xff] }
 0x152   :  { %v2491_v20 = vpop.eup %2490  ;;  %v3380_v13 = vmul.f32 %v2489_v59, %v3228_v54  ;;  %2510 = vrcp.f32 %v915_v63  ;;  %v1868_v29 = vmul.f32 -1.442695, %v3372_v3 }
 0x153   :  { %v2493_v22 = vpop.eup %2492  ;;  %v3384_v41 = vmul.f32 %v2491_v20, %v3236_v49  ;;  %2512 = vrcp.f32 %v914_v14  ;;  %v2188_v43 = vpop.f32.mrb[58].mxu0  ;;  %v1867_v57 = vmul.f32 -1.442695, %v3377_v31 }
 0x154   :  { %v2495_v47 = vpop.eup %2494  ;;  %v917_v46 = vadd.f32 1.0, %v2493_v22  ;;  %2514 = vpow2.f32 %v1865_v35  ;;  %2244 = vmatpush3.bf16.xpose.msk.msra.mxu1 %vm3136_vm2, %v2242_v16  ;;  %v3395_v54 = vadd.f32 %v2600_v6, %v2188_v43  ;;  %v645_v49 = vpop.f32.mrb[59].mxu0 }
 0x155   :  { %v2497_v62 = vpop.eup %2496  ;;  %v2284_v5 = vpack.c.bf16 %v3380_v13, %v3384_v41  ;;  %v916_v25 = vadd.f32 1.0, %v2495_v47  ;;  %2516 = vpow2.f32 %v1868_v29  ;;  %2247 = vmatprep.subr.msk.bf16.mxu1 %vm3136_vm2, %v2245_v1  ;;  %v3404_v53 = vadd.f32 %v2600_v6, %v645_v49 }
 0x156   :  { %v2499_v0 = vpop.eup %2498  ;;  %v3407_v16 = vmul.f32 %v2497_v62, %v3246_v15  ;;  %2518 = vrcp.f32 %v917_v46  ;;  %v1870_v33 = vmul.f32 -1.442695, %v3395_v54 }
 0x157   :  { %v2501_v60 = vpop.eup %2500  ;;  %2520 = vrcp.f32 %v916_v25  ;;  %v919_v61 = vadd.f32 1.0, %v2499_v0  ;;  %v1869_v51 = vmul.f32 -1.442695, %v3404_v53  ;;  %v2191_v45 = vpop.f32.mrb[60].mxu0 }
 0x158   :  { %v2503_v63 = vpop.eup %2502  ;;  %v3412_v37 = vmul.f32 %v2501_v60, %v3252_v39  ;;  %2522 = vpow2.f32 %v1867_v57  ;;  %v3414_v50 = vadd.f32 %v2600_v6, %v2191_v45  ;;  %v655_v1 = vpop.f32.mrb[61].mxu0 }
 0x159   :  { %v2505_v35 = vpop.eup %2504  ;;  %v3417_v15 = vmul.f32 %v2503_v63, %v3267_v12  ;;  %2524 = vrcp.f32 %v919_v61  ;;  %v3419_v36 = vadd.f32 %v2600_v6, %v655_v1 }
 0x15a   :  { %v2507_v59 = vpop.eup %2506  ;;  %v2290_v14 = vpack.c.bf16 %v3407_v16, %v3412_v37  ;;  %v3424_v20 = vmul.f32 %v2505_v35, %v3275_v11  ;;  %2526 = vpow2.f32 %v1870_v33  ;;  %v1872_v39 = vmul.f32 -1.442695, %v3414_v50 }
 0x15b   :  { %v2509_v29 = vpop.eup %2508  ;;  %v918_v22 = vadd.f32 1.0, %v2507_v59  ;;  %2528 = vpow2.f32 %v1869_v51  ;;  %v1871_v43 = vmul.f32 -1.442695, %v3419_v36  ;;  %v2194_v12 = vpop.f32.mrb[62].mxu0 }
 0x15c   :  { %v2511_v47 = vpop.eup %2510  ;;  %v2296_v46 = vpack.c.bf16 %v3417_v15, %v3424_v20  ;;  %v921_v57 = vadd.f32 1.0, %v2509_v29  ;;  %2530 = vpow2.f32 %v1872_v39  ;;  %2250 = vmatpush3.bf16.xpose.msk.msra.mxu1 %vm3136_vm2, %v2248_v52  ;;  %v3435_v11 = vadd.f32 %v2600_v6, %v2194_v12  ;;  %v665_v49 = vpop.f32.mrb[63].mxu0 }
 0x15d   :  { %v2513_v62 = vpop.eup %2512  ;;  %v1107_v25 = vmul.f32 %v2511_v47, %v3291_v19  ;;  %2532 = vrcp.f32 %v918_v22  ;;  %v3438_v0 = vadd.f32 %v2600_v6, %v665_v49 }
 0x15e   :  { %v2515_v33 = vpop.eup %2514  ;;  %v1106_v60 = vmul.f32 %v2513_v62, %v3296_v30  ;;  %2534 = vrcp.f32 %v921_v57  ;;  %v1874_v61 = vmul.f32 -1.442695, %v3435_v11  ;;  %v3447_v30 = vld [vmem:[%s3633_s3 + $0x8] sm:$0x3f] }
 0x15f   :  { %v2517_v51 = vpop.eup %2516  ;;  %v920_v32 = vadd.f32 1.0, %v2515_v33  ;;  %2536 = vpow2.f32 %v1871_v43  ;;  %v1873_v17 = vmul.f32 -1.442695, %v3438_v0 }
 0x160   :  { %v2519_v52 = vpop.eup %2518  ;;  %v2251_v45 = vpack.c.bf16 %v1107_v25, %v1106_v60  ;;  %v923_v63 = vadd.f32 1.0, %v2517_v51  ;;  %2538 = vpow2.f32 %v1874_v61 }
 0x161   :  { %v2521_v1 = vpop.eup %2520  ;;  %v1109_v19 = vmul.f32 %v2519_v52, %v3312_v23  ;;  %2540 = vrcp.f32 %v920_v32  ;;  %v3455_v23 = vld [vmem:[%s3633_s3] sm:$0xff]  ;;  %s2627_s3 = smov [#allocation2]  }
 0x162   :  { %v2523_v6 = vpop.eup %2522  ;;  %v1108_v35 = vmul.f32 %v2521_v1, %v3322_v27  ;;  %2542 = vrcp.f32 %v923_v63  ;;  %2253 = vmatprep.subr.msk.bf16.mxu1 %vm3136_vm2, %v2251_v45  ;;  %s1735_s9 = sshll.u32 %s2627_s3, 4  ;;  %s1736_s9 = int_to_ptr.vmem [resolvable:$true] %s1735_s9 }
 0x163   :  { %v2525_v59 = vpop.eup %2524  ;;  %v922_v39 = vadd.f32 1.0, %v2523_v6  ;;  %2544 = vpow2.f32 %v1873_v17  ;;  %2052 = vmatmul.mubr.msk.f32.vlgmr.msra.gmra.mrb[0].mxu1 %vm1136_vm1, %v3455_v23  ;;  %s2602_s10 = scalar_lea.vmem %s1736_s9, 1024  ;;  %p2607_p1 = scmp.lt.s32.totalorder %s1736_s9, %s1736_s9 }
 0x164   :  { %v2527_v29 = vpop.eup %2526  ;;  %v2257_v22 = vpack.c.bf16 %v1109_v19, %v1108_v35  ;;  %2256 = vmatpush3.bf16.xpose.msk.msra.mxu1 %vm3136_vm2, %v2254_v7  ;;  %2053 = vmatprep.mubr.msk.f32.mxu1 %vm1136_vm1, %v3447_v30  ;;  %v1111_v47 = vmul.f32 %v2525_v59, %v3333_v40  ;;  %p2603_p0 = scmp.ne.s32.totalorder %s1736_s9, %s2602_s10  ;;  %p2608_p2 = scmp.lt.s32.totalorder %s2602_s10, %s2602_s10 }
 0x165   :  { %v2529_v27 = vpop.eup %2528  ;;  %2546 = vrcp.f32 %v922_v39  ;;  %v925_v43 = vadd.f32 1.0, %v2527_v29 }
 0x166   :  { %v2531_v12 = vpop.eup %2530  ;;  %v924_v57 = vadd.f32 1.0, %v2529_v27  ;;  %2259 = vmatprep.subr.msk.bf16.mxu1 %vm3136_vm2, %v2257_v22  ;;  %p2609_p3 = por %p2608_p2, %p2607_p1 }
 0x167   :  { %v2533_v49 = vpop.eup %2532  ;;  %2548 = vrcp.f32 %v925_v43  ;;  %v927_v62 = vadd.f32 1.0, %v2531_v12  ;;  %2054 = vmatmul.mubr.msk.f32.gmra.mrb[2].mxu1 %vm1136_vm1, %v3447_v30 }
 0x168   :  { %v2535_v8 = vpop.eup %2534  ;;  %v1110_v10 = vmul.f32 %v2533_v49, %v3338_v42  ;;  %2550 = vrcp.f32 %v924_v57  ;;  %2087 = vmatprep.mubr.msk.f32.mxu1 %vm1136_vm1, %v3455_v23  ;;  %v1489_v57 = vlaneseq  ;;  %p2610_p4 = pnand %p2609_p3, %p2603_p0 }
 0x169   :  { %v2537_v7 = vpop.eup %2536  ;;  %2552 = vrcp.f32 %v927_v62  ;;  %v1113_v33 = vmul.f32 %v2535_v8, %v3353_v9 }
 0x16a   :  { %v2539_v40 = vpop.eup %2538  ;;  %v2263_v25 = vpack.c.bf16 %v1111_v47, %v1110_v10  ;;  %v926_v60 = vadd.f32 1.0, %v2537_v7 }
 0x16b   :  { %v2541_v61 = vpop.eup %2540  ;;  %v929_v51 = vadd.f32 1.0, %v2539_v40  ;;  %v3555_v40 = vshrl.u32 %v1489_v57, 7 }
 0x16c   :  { %v2543_v32 = vpop.eup %2542  ;;  %v1112_v17 = vmul.f32 %v2541_v61, %v3361_v38  ;;  %2554 = vrcp.f32 %v926_v60  ;;  %2262 = vmatpush3.bf16.xpose.msk.msra.mxu1 %vm3136_vm2, %v2260_v2 }
 0x16d   :  { %v2545_v42 = vpop.eup %2544  ;;  %2556 = vrcp.f32 %v929_v51  ;;  %2265 = vmatprep.subr.msk.bf16.mxu1 %vm3136_vm2, %v2263_v25  ;;  %v1115_v9 = vmul.f32 %v2543_v32, %v3372_v3  ;;  %vm1552_vm5 = vcmp.eq.s32.totalorder %v3555_v40, 5  ;;  %vm1502_vm6 = vcmp.le.s32.totalorder %v3555_v40, 4 }
 0x16e   :  { %v2269_v52 = vpack.c.bf16 %v1113_v33, %v1112_v17  ;;  %v928_v45 = vadd.f32 1.0, %v2545_v42  ;;  %vm1492_vm8 = vcmp.eq.s32.totalorder %v3555_v40, 0 }
 0x16f   :  { %v2547_v63 = vpop.eup %2546 }
 0x170   :  { %v1114_v1 = vmul.f32 %v2547_v63, %v3377_v31  ;;  %2558 = vrcp.f32 %v928_v45 }
 0x171   :  { %v2549_v38 = vpop.eup %2548 }
 0x172   :  { %v2551_v19 = vpop.eup %2550  ;;  %v2275_v6 = vpack.c.bf16 %v1115_v9, %v1114_v1  ;;  %v1117_v34 = vmul.f32 %v2549_v38, %v3395_v54 }
 0x173   :  { %v2553_v26 = vpop.eup %2552  ;;  %v1116_v2 = vmul.f32 %v2551_v19, %v3404_v53 }
 0x174   :  { %2268 = vmatpush3.bf16.xpose.msk.msra.mxu1 %vm3136_vm2, %v2266_v18  ;;  %v1119_v35 = vmul.f32 %v2553_v26, %v3414_v50 }
 0x175   :  { %v2281_v3 = vpack.c.bf16 %v1117_v34, %v1116_v2  ;;  %2271 = vmatprep.subr.msk.bf16.mxu1 %vm3136_vm2, %v2269_v52 }
 0x176   :  { %v2555_v31 = vpop.eup %2554 }
 0x177   :  { %v2557_v59 = vpop.eup %2556  ;;  %v1118_v39 = vmul.f32 %v2555_v31, %v3419_v36 }
 0x178   :  { %v1121_v29 = vmul.f32 %v2557_v59, %v3435_v11 }
 0x179   :  { %v2287_v54 = vpack.c.bf16 %v1119_v35, %v1118_v39 }
 0x17a   :  { %v2559_v53 = vpop.eup %2558 }
 0x17b   :  { %v1120_v22 = vmul.f32 %v2559_v53, %v3438_v0 }
 0x17c   :  { %2274 = vmatpush3.bf16.xpose.msk.msra.mxu1 %vm3136_vm2, %v2272_v21 }
 0x17d   :  { %v2293_v4 = vpack.c.bf16 %v1121_v29, %v1120_v22  ;;  %2277 = vmatprep.subr.msk.bf16.mxu1 %vm3136_vm2, %v2275_v6 }
 0x184   :  { %2280 = vmatpush3.bf16.xpose.msk.msra.mxu1 %vm3136_vm2, %v2278_v28 }
 0x185   :  { %2283 = vmatprep.subr.msk.bf16.mxu1 %vm3136_vm2, %v2281_v3 }
 0x18c   :  { %2286 = vmatpush3.bf16.xpose.msk.msra.mxu1 %vm3136_vm2, %v2284_v5 }
 0x18d   :  { %2289 = vmatprep.subr.msk.bf16.mxu1 %vm3136_vm2, %v2287_v54 }
 0x194   :  { %2292 = vmatpush3.bf16.xpose.msk.msra.mxu1 %vm3136_vm2, %v2290_v14 }
 0x195   :  { %2295 = vmatprep.subr.msk.bf16.mxu1 %vm3136_vm2, %v2293_v4 }
 0x19c   :  { %2298 = vmatpush3.bf16.xpose.msk.msra.mxu1 %vm3136_vm2, %v2296_v46 }
 0x1a3   :  { %2088 = vmatmul.mubr.msk.f32.vlgmr.msra.gmra.mrb[4].mxu1 %vm1136_vm1, %v3455_v23 }
 0x1a4   :  { %2089 = vmatprep.mubr.msk.f32.mxu1 %vm1136_vm1, %v3447_v30 }
 0x1a5   :  { %v3537_v44 = vpop.permute.xlu0 %1128 }
 0x1a7   :  { %2090 = vmatmul.mubr.msk.f32.gmra.mrb[6].mxu1 %vm1136_vm1, %v3447_v30 }
 0x1a9   :  { %v3545_v24 = vpop.permute.xlu0 %1133 }
 0x236   :  { %v1401_v56 = vpop.f32.mrb[0].mxu1 }
 0x237   :  { %v3540_v18 = vadd.f32 %v1401_v56, %v3537_v44  ;;  %v1403_v55 = vpop.f32.mrb[1].mxu1 }
 0x238   :  { %v3543_v21 = vadd.f32 %v1403_v55, %v3537_v44 }
 0x239   :  { %v1578_v48 = vand.u32 2147483647, %v3540_v18  ;;  %v1943_v15 = vmul.f32 -1.442695, %v3540_v18  ;;  %v1554_v61 = vmax.f32 %v3540_v18, 0.0  ;;  %vm1562_vm7 = vcmp.ne.f32.partialorder %v3540_v18, %v3540_v18 }
 0x23a   :  { %v1407_v58 = vpop.f32.mrb[2].mxu1  ;;  %v1579_v28 = vand.u32 2147483647, %v3543_v21  ;;  %v1944_v14 = vmul.f32 -1.442695, %v3543_v21  ;;  %v1555_v42 = vmax.f32 %v3543_v21, 0.0  ;;  %vm1563_vm9 = vcmp.ne.f32.partialorder %v3543_v21, %v3543_v21 }
 0x23b   :  { %v1408_v13 = vadd.f32 %v1407_v58, %v3545_v24  ;;  %v1409_v41 = vpop.f32.mrb[3].mxu1  ;;  %v1586_v5 = vsub.f32 0.0, %v1578_v48 }
 0x23c   :  { %v1410_v16 = vadd.f32 %v1409_v41, %v3545_v24  ;;  %v1587_v37 = vsub.f32 0.0, %v1579_v28 }
 0x23d   :  { %1726 = vst [vmem:[#allocation2 + $0x20] sm:$0x3f] %v1408_v13  ;;  %v1594_v50 = vmul.f32 1.442695, %v1586_v5 }
 0x23e   :  { %1727 = vst [vmem:[#allocation2 + $0x28] sm:$0x3f] %v1410_v16  ;;  %v1596_v36 = vmul.f32 1.442695, %v1587_v37 }
 0x23f   :  { %2560 = vpow2.f32 %v1594_v50 }
 0x240   :  { %2562 = vpow2.f32 %v1596_v36 }
 0x241   :  { %2564 = vpow2.f32 %v1943_v15 }
 0x242   :  { %2566 = vpow2.f32 %v1944_v14 }
 0x249   :  { %v2561_v20 = vpop.eup %2560 }
 0x24a   :  { %v2563_v46 = vpop.eup %2562  ;;  %v1610_v11 = vadd.f32 1.0, %v2561_v20  ;;  %v1613_v43 = vmul.f32 -0.5, %v2561_v20  ;;  %v1616_v62 = vand.u32 2147483647, %v2561_v20 }
 0x24b   :  { %v1619_v0 = vadd.f32 1.0, %v2563_v46  ;;  %v2565_v30 = vpop.eup %2564  ;;  %v1622_v47 = vmul.f32 -0.5, %v2563_v46  ;;  %v1625_v10 = vand.u32 2147483647, %v2563_v46 }
 0x24c   :  { %2568 = vlog2.f32 %v1610_v11  ;;  %v2567_v23 = vpop.eup %2566  ;;  %v1528_v27 = vadd.f32 1.0, %v2565_v30  ;;  %v1614_v49 = vadd.f32 1.0, %v1613_v43  ;;  %vm1617_vm3 = vcmp.lt.f32.partialorder %v1616_v62, 0.0004427343 }
 0x24d   :  { %2570 = vlog2.f32 %v1619_v0  ;;  %v1529_v12 = vadd.f32 1.0, %v2567_v23  ;;  %v1623_v8 = vadd.f32 1.0, %v1622_v47  ;;  %vm1626_vm4 = vcmp.lt.f32.partialorder %v1625_v10, 0.0004427343 }
 0x24e   :  { %2572 = vtanh.f32 %v3540_v18  ;;  %v1615_v60 = vmul.f32 %v2561_v20, %v1614_v49 }
 0x24f   :  { %2574 = vrcp.f32 %v1528_v27  ;;  %v1624_v32 = vmul.f32 %v2563_v46, %v1623_v8 }
 0x250   :  { %2576 = vrcp.f32 %v1529_v12 }
 0x251   :  { %2578 = vtanh.f32 %v3543_v21 }
 0x256   :  { %v2569_v7 = vpop.eup %2568 }
 0x257   :  { %v2571_v25 = vpop.eup %2570  ;;  %v1612_v33 = vmul.f32 0.6931472, %v2569_v7 }
 0x258   :  { %v1621_v51 = vmul.f32 0.6931472, %v2571_v25  ;;  %v2573_v63 = vpop.eup %2572 }
 0x259   :  { %v1618_v17 = vsel %vm1617_vm3, %v1615_v60, %v1612_v33  ;;  %v2575_v38 = vpop.eup %2574 }
 0x25a   :  { %v1682_v52 = vadd.f32 %v1618_v17, %v1554_v61  ;;  %v1627_v9 = vsel %vm1626_vm4, %v1624_v32, %v1621_v51  ;;  %v2577_v34 = vpop.eup %2576 }
 0x25b   :  { %v1683_v45 = vadd.f32 %v1627_v9, %v1555_v42  ;;  %v2579_v3 = vpop.eup %2578 }
 0x25c   :  { %v1690_v1 = vsel %vm1562_vm7, %v3540_v18, %v1682_v52 }
 0x25d   :  { %v1698_v19 = vsel %vm1552_vm5, %v1690_v1, %v3540_v18  ;;  %v1691_v6 = vsel %vm1563_vm9, %v3543_v21, %v1683_v45 }
 0x25e   :  { %v1706_v26 = vsel %vm1502_vm6, %v2575_v38, %v1698_v19  ;;  %v1699_v2 = vsel %vm1552_vm5, %v1691_v6, %v3543_v21 }
 0x25f   :  { %v1714_v35 = vsel %vm1492_vm8, %v2573_v63, %v1706_v26  ;;  %v1707_v31 = vsel %vm1502_vm6, %v2577_v34, %v1699_v2 }
 0x260   :  { %1722 = vst [vmem:[#allocation2] sm:$0xff] %v1714_v35  ;;  %v1715_v59 = vsel %vm1492_vm8, %v2579_v3, %v1707_v31 }
 0x261   :  { %1723 = vst [vmem:[#allocation2 + $0x8] sm:$0xff] %v1715_v59 }
 0x276   :  { %v1478_v39 = vpop.f32.mrb[4].mxu1 }
 0x277   :  { %v3583_v54 = vadd.f32 %v1478_v39, %v3537_v44  ;;  %v1480_v29 = vpop.f32.mrb[5].mxu1 }
 0x278   :  { %v3586_v53 = vadd.f32 %v1480_v29, %v3537_v44 }
 0x279   :  { %v1580_v22 = vand.u32 2147483647, %v3583_v54  ;;  %v1945_v13 = vmul.f32 -1.442695, %v3583_v54  ;;  %v1556_v57 = vmax.f32 %v3583_v54, 0.0  ;;  %vm1564_vm12 = vcmp.ne.f32.partialorder %v3583_v54, %v3583_v54 }
 0x27a   :  { %v1484_v4 = vpop.f32.mrb[6].mxu1  ;;  %v1581_v56 = vand.u32 2147483647, %v3586_v53  ;;  %v1946_v44 = vmul.f32 -1.442695, %v3586_v53  ;;  %v1557_v10 = vmax.f32 %v3586_v53, 0.0  ;;  %vm1565_vm13 = vcmp.ne.f32.partialorder %v3586_v53, %v3586_v53 }
 0x27b   :  { %v1485_v18 = vadd.f32 %v1484_v4, %v3545_v24  ;;  %v1486_v55 = vpop.f32.mrb[7].mxu1  ;;  %v1588_v21 = vsub.f32 0.0, %v1580_v22 }
 0x27c   :  { %v1487_v48 = vadd.f32 %v1486_v55, %v3545_v24  ;;  %v1589_v58 = vsub.f32 0.0, %v1581_v56 }
 0x27d   :  { %1728 = vst [vmem:[#allocation2 + $0x30] sm:$0x3f] %v1485_v18  ;;  %v1598_v28 = vmul.f32 1.442695, %v1588_v21 }
 0x27e   :  { %1729 = vst [vmem:[#allocation2 + $0x38] sm:$0x3f] %v1487_v48  ;;  %v1600_v41 = vmul.f32 1.442695, %v1589_v58 }
 0x27f   :  { %2580 = vpow2.f32 %v1598_v28 }
 0x280   :  { %2582 = vpow2.f32 %v1600_v41 }
 0x281   :  { %2584 = vpow2.f32 %v1945_v13 }
 0x282   :  { %2586 = vpow2.f32 %v1946_v44 }
 0x289   :  { %v2581_v5 = vpop.eup %2580 }
 0x28a   :  { %v2583_v16 = vpop.eup %2582  ;;  %v1628_v37 = vadd.f32 1.0, %v2581_v5  ;;  %v1631_v14 = vmul.f32 -0.5, %v2581_v5  ;;  %v1634_v0 = vand.u32 2147483647, %v2581_v5 }
 0x28b   :  { %v1637_v50 = vadd.f32 1.0, %v2583_v16  ;;  %v2585_v15 = vpop.eup %2584  ;;  %v1640_v46 = vmul.f32 -0.5, %v2583_v16  ;;  %v1643_v23 = vand.u32 2147483647, %v2583_v16 }
 0x28c   :  { %2588 = vlog2.f32 %v1628_v37  ;;  %v2587_v24 = vpop.eup %2586  ;;  %v1530_v36 = vadd.f32 1.0, %v2585_v15  ;;  %v1632_v11 = vadd.f32 1.0, %v1631_v14  ;;  %vm1635_vm10 = vcmp.lt.f32.partialorder %v1634_v0, 0.0004427343 }
 0x28d   :  { %2590 = vlog2.f32 %v1637_v50  ;;  %v1531_v20 = vadd.f32 1.0, %v2587_v24  ;;  %v1641_v30 = vadd.f32 1.0, %v1640_v46  ;;  %vm1644_vm11 = vcmp.lt.f32.partialorder %v1643_v23, 0.0004427343 }
 0x28e   :  { %2592 = vtanh.f32 %v3583_v54  ;;  %v1633_v47 = vmul.f32 %v2581_v5, %v1632_v11 }
 0x28f   :  { %2594 = vrcp.f32 %v1530_v36  ;;  %v1642_v62 = vmul.f32 %v2583_v16, %v1641_v30 }
 0x290   :  { %2596 = vrcp.f32 %v1531_v20 }
 0x291   :  { %2598 = vtanh.f32 %v3586_v53 }
 0x296   :  { %v2589_v27 = vpop.eup %2588 }
 0x297   :  { %v2591_v43 = vpop.eup %2590  ;;  %v1630_v12 = vmul.f32 0.6931472, %v2589_v27 }
 0x298   :  { %v1639_v49 = vmul.f32 0.6931472, %v2591_v43  ;;  %v2593_v60 = vpop.eup %2592 }
 0x299   :  { %v1636_v8 = vsel %vm1635_vm10, %v1633_v47, %v1630_v12  ;;  %v2595_v51 = vpop.eup %2594 }
 0x29a   :  { %v1684_v7 = vadd.f32 %v1636_v8, %v1556_v57  ;;  %v1645_v25 = vsel %vm1644_vm11, %v1642_v62, %v1639_v49  ;;  %v2597_v42 = vpop.eup %2596 }
 0x29b   :  { %v1685_v33 = vadd.f32 %v1645_v25, %v1557_v10  ;;  %v2599_v45 = vpop.eup %2598 }
 0x29c   :  { %v1692_v61 = vsel %vm1564_vm12, %v3583_v54, %v1684_v7 }
 0x29d   :  { %v1700_v32 = vsel %vm1552_vm5, %v1692_v61, %v3583_v54  ;;  %v1693_v17 = vsel %vm1565_vm13, %v3586_v53, %v1685_v33 }
 0x29e   :  { %v1708_v52 = vsel %vm1502_vm6, %v2595_v51, %v1700_v32  ;;  %v1701_v9 = vsel %vm1552_vm5, %v1693_v17, %v3586_v53 }
 0x29f   :  { %v1716_v63 = vsel %vm1492_vm8, %v2593_v60, %v1708_v52  ;;  %v1709_v1 = vsel %vm1502_vm6, %v2597_v42, %v1701_v9 }
 0x2a0   :  { %1724 = vst [vmem:[#allocation2 + $0x10] sm:$0xff] %v1716_v63  ;;  %v1717_v38 = vsel %vm1492_vm8, %v2599_v45, %v1709_v1 }
 0x2a1   :  { %1725 = vst [vmem:[#allocation2 + $0x18] sm:$0xff] %v1717_v38 }
 0x2a2   :  { %2613 = shalt.err (!%p2610_p4)
}
 0x2a3   :  { %s2614_s13 = scalar_lea.hbm %s3635_s5, 1024 }
 0x2a4   :  { %p2615_p5 = scmp.ne.s32.totalorder %s3635_s5, %s2614_s13  ;;  %p2618_p6 = scmp.lt.u32.totalorder %s2614_s13, %s3635_s5 }
 0x2a6   :  { %p2620_p7 = pnand %p2618_p6, %p2615_p5 }
 0x2a8   :  { %2623 = shalt.err (!%p2620_p7)
}
 0x2a9   :  { %s2628_s18 = smov 512   ;;  %s2629_s19 = smov 32  }
 0x2aa   :  { %1741 = dma.vmem_to_hbm [thread:$0]  %s1736_s9, 1024, %s3635_s5, [#allocation3], %s2628_s18, %s2628_s18, %s2629_s19  }
 0x2ab   :  { %2624 = dma.done.wait [#allocation3], 1024  }
 0x2ac   :  { %2625 = vsyncadd [#allocation3], 4294966272 }
 0x2ad   :  { %1745 = vsyncpa [#allocation3], 1 }

</bundles_post_ra>
